<compile_context>
chip_gen: v6e
topology: v6e:2x2x1
jax: 0.10.0
libtpu: 0.0.40
codegen_flags: <defaults>
</compile_context>

<pallas_src>
import math

import jax
import jax.numpy as jnp
from jax import lax
from jax.experimental import pallas as pl
from jax.experimental.pallas import tpu as pltpu


# -----------------------------------------------------------------------------
# Kernel: one (sequence b, query-tile qi) block per grid step.
# -----------------------------------------------------------------------------
def _prot_encoder_kernel(
    xq_ref,     # (tq, H)  f32  query-tile token embeddings of sequence b
    xs_ref,     # (S, H)   f32  full-sequence token embeddings of sequence b (keys / values)
    kmask_ref,  # (1, S)   f32  key validity mask of sequence b
    qmask_ref,  # (tq, 1)  f32  query-tile validity mask (pooling weights)
    wqkv_ref,   # (H, 3H)  bf16 fused Q|K|V projection
    bqkv_ref,   # (1, 3H)  f32
    wo_ref,     # (H, H)   bf16
    w1_ref,     # (H, F)   bf16
    b1_ref,     # (1, F)   f32
    w2_ref,     # (F, H)   bf16
    vecs_ref,   # (6, H)   f32  rows: bo, ln1_gamma, ln1_beta, b2, ln2_gamma, ln2_beta
    hid_ref,    # (tq, H)  f32  out: hidden states of this (b, q-tile)
    mean_ref,   # (1, H)   f32  out: masked-mean, accumulated over query tiles
    cnt_ref,    # (1, 1)   f32  scratch: valid-token count accumulator
):
    qi = pl.program_id(1)
    nq = pl.num_programs(1)

    H = xq_ref.shape[-1]
    scale = 1.0 / math.sqrt(H)
    eps = 1e-5
    cdt = jnp.bfloat16

    x_q = xq_ref[...]                       # (tq, H) f32
    x_s = xs_ref[...]                       # (S, H)  f32
    x_q_b = x_q.astype(cdt)
    x_s_b = x_s.astype(cdt)

    # --- Q from the query tile; K, V from the full sequence.  bf16 operands, f32 accumulation.
    #     Weight slices are static & lane-aligned (H multiple of 128) -> ref views, no copies.
    q = jnp.dot(x_q_b, wqkv_ref[:, 0:H],
                preferred_element_type=jnp.float32) + bqkv_ref[:, 0:H]
    k = jnp.dot(x_s_b, wqkv_ref[:, H:2 * H],
                preferred_element_type=jnp.float32) + bqkv_ref[:, H:2 * H]
    v = jnp.dot(x_s_b, wqkv_ref[:, 2 * H:3 * H],
                preferred_element_type=jnp.float32) + bqkv_ref[:, 2 * H:3 * H]

    # --- scores (tq, S): contract the feature dim of both operands (no explicit K transpose).
    scores = lax.dot_general(q.astype(cdt), k.astype(cdt), (((1,), (1,)), ((), ())),
                             preferred_element_type=jnp.float32) * scale
    # Key-padding mask generated in-kernel from the (1, S) mask vector; applied in f32.
    scores = scores + (kmask_ref[...] - 1.0) * 1e9

    smax = jnp.max(scores, axis=-1, keepdims=True)
    p = jnp.exp(scores - smax)
    p = p * pl.reciprocal(jnp.sum(p, axis=-1, keepdims=True), approx=True)

    attn = jnp.dot(p.astype(cdt), v.astype(cdt), preferred_element_type=jnp.float32)
    attn = jnp.dot(attn.astype(cdt), wo_ref[...],
                   preferred_element_type=jnp.float32) + vecs_ref[0:1, :]

    # --- residual + layernorm 1 (f32 statistics) ---
    h = x_q + attn
    mu = jnp.mean(h, axis=-1, keepdims=True)
    var = jnp.mean((h - mu) ** 2, axis=-1, keepdims=True)
    hn = (h - mu) * lax.rsqrt(var + eps) * vecs_ref[1:2, :] + vecs_ref[2:3, :]

    # --- feed-forward (bf16 matmuls, f32 elementwise) ---
    # TODO(synk): PyTorch nn.GELU defaults to exact erf; tanh approximation kept here (EUP path).
    ff = jnp.dot(hn.astype(cdt), w1_ref[...], preferred_element_type=jnp.float32) + b1_ref[...]
    ff = jax.nn.gelu(ff)
    ff = jnp.dot(ff.astype(cdt), w2_ref[...],
                 preferred_element_type=jnp.float32) + vecs_ref[3:4, :]

    # --- residual + layernorm 2 -> hidden states (embedding_repr) ---
    h2 = hn + ff
    mu2 = jnp.mean(h2, axis=-1, keepdims=True)
    var2 = jnp.mean((h2 - mu2) ** 2, axis=-1, keepdims=True)
    hidden = (h2 - mu2) * lax.rsqrt(var2 + eps) * vecs_ref[4:5, :] + vecs_ref[5:6, :]

    hid_ref[...] = hidden

    # --- masked-mean pooling: accumulate masked row-sums + valid-token count over query tiles;
    #     divide once on the last tile.  max(count, 1) guards zero-length sequences. ---
    @pl.when(qi == 0)
    def _init():
        mean_ref[...] = jnp.zeros_like(mean_ref)
        cnt_ref[...] = jnp.zeros_like(cnt_ref)

    qmask = qmask_ref[...]                                        # (tq, 1)
    mean_ref[...] += jnp.sum(hidden * qmask, axis=0, keepdims=True)
    cnt_ref[...] += jnp.sum(qmask, keepdims=True)

    @pl.when(qi == nq - 1)
    def _finalize():
        mean_ref[...] = mean_ref[...] / jnp.maximum(cnt_ref[...], 1.0)


# -----------------------------------------------------------------------------
# Wrapper
# -----------------------------------------------------------------------------
def prot_encoder_pallas(x, attention_mask, params, *, tq=None):
    """x: (B, S, H) token embeddings; attention_mask: (B, S) of 0/1.

    Returns (mean_embedding_repr (B, H), embedding_repr (B, S, H)) - same as the torch module.
    """
    B, S, H = x.shape
    F = params["w1"].shape[1]
    assert H % 128 == 0 and F % 128 == 0, "keep last dims lane-dense (multiples of 128)"

    if tq is None:
        tq = min(S, 256)
    if S % tq != 0 or tq % 8 != 0:
        tq = S                       # fall back: one tile per sequence
    nq = S // tq

    cdt = jnp.bfloat16
    # ---- host-side packing (batch-invariant) ----
    wqkv = jnp.concatenate([params["wq"], params["wk"], params["wv"]], axis=1).astype(cdt)
    bqkv = jnp.concatenate([params["bq"], params["bk"], params["bv"]], axis=1).astype(jnp.float32)
    wo = params["wo"].astype(cdt)
    w1 = params["w1"].astype(cdt)
    b1 = params["b1"].astype(jnp.float32)
    w2 = params["w2"].astype(cdt)
    vecs = jnp.concatenate([params["bo"], params["ln1g"], params["ln1b"],
                            params["b2"], params["ln2g"], params["ln2b"]],
                           axis=0).astype(jnp.float32)             # (6, H)

    x_f32 = x.astype(jnp.float32)
    mask = attention_mask.astype(jnp.float32)
    kmask = mask.reshape(B, 1, S)                                   # key mask per sequence
    qmask = mask.reshape(B, S, 1)                                   # query mask per tile

    # Grid-invariant blocks: constant index map, single-buffered (no wasted double buffer).
    def wspec(shape):
        return pl.BlockSpec(shape, lambda b, q: (0, 0), pipeline_mode=pl.Buffered(1))

    in_specs = [
        pl.BlockSpec((None, tq, H), lambda b, q: (b, q, 0)),        # x: query tile
        pl.BlockSpec((None, S, H), lambda b, q: (b, 0, 0)),         # x: full sequence (K/V)
        pl.BlockSpec((None, 1, S), lambda b, q: (b, 0, 0)),         # key mask
        pl.BlockSpec((None, tq, 1), lambda b, q: (b, q, 0)),        # query-tile mask
        wspec((H, 3 * H)),                                          # wqkv  (bf16)
        wspec((1, 3 * H)),                                          # bqkv  (f32)
        wspec((H, H)),                                              # wo    (bf16)
        wspec((H, F)),                                              # w1    (bf16)
        wspec((1, F)),                                              # b1    (f32)
        wspec((F, H)),                                              # w2    (bf16)
        wspec((6, H)),                                              # packed bias/LN vectors
    ]
    out_specs = (
        pl.BlockSpec((None, tq, H), lambda b, q: (b, q, 0)),        # hidden states
        pl.BlockSpec((None, 1, H), lambda b, q: (b, 0, 0)),         # mean (accumulated over q)
    )
    out_shape = (jax.ShapeDtypeStruct((B, S, H), jnp.float32),
                 jax.ShapeDtypeStruct((B, 1, H), jnp.float32))

    # ---- advisory cost estimate ----
    M = B * S
    flops = (2 * M * H * 3 * H        # QKV projections
             + 4 * B * S * S * H      # QK^T and PV
             + 2 * M * H * H          # output projection
             + 4 * M * H * F)         # FFN
    transcendentals = B * S * S + M * F
    bytes_accessed = (x_f32.size * 4
                      + (wqkv.size + wo.size + w1.size + w2.size) * 2
                      + (bqkv.size + b1.size + vecs.size) * 4
                      + M * H * 4 + B * H * 4 + 2 * M * 4)

    # ---- VMEM budget: single-buffered weights + double-buffered activation/output blocks,
    #      plus margin for Mosaic internal scratch / tile padding. ----
    weight_bytes = ((wqkv.size + wo.size + w1.size + w2.size) * 2
                    + (bqkv.size + b1.size + vecs.size) * 4)
    act_block_bytes = (tq * H + S * H + S + tq) * 4
    out_block_bytes = (tq * H + H) * 4
    vmem_limit = int(min(weight_bytes + 2 * (act_block_bytes + out_block_bytes) + (8 << 20),
                         96 << 20))

    hid, mean = pl.pallas_call(
        _prot_encoder_kernel,
        out_shape=out_shape,
        grid=(B, nq),
        in_specs=in_specs,
        out_specs=out_specs,
        scratch_shapes=[pltpu.VMEM((1, 1), jnp.float32)],
        compiler_params=pltpu.CompilerParams(
            dimension_semantics=("parallel", "arbitrary"),   # batch -> both TCs on v7x
            vmem_limit_bytes=vmem_limit,
        ),
        cost_estimate=pl.CostEstimate(flops=int(flops),
                                      transcendentals=int(transcendentals),
                                      bytes_accessed=int(bytes_accessed)),
    )(x_f32, x_f32, kmask, qmask, wqkv, bqkv, wo, w1, b1, w2, vecs)

    return mean.reshape(B, H), hid


# -----------------------------------------------------------------------------
# Pure-JAX (f32) reference with the same math, for the correctness check.
# -----------------------------------------------------------------------------
def prot_encoder_ref(x, attention_mask, params):
    H = x.shape[-1]
    scale = 1.0 / math.sqrt(H)
    eps = 1e-5
    m = attention_mask.astype(jnp.float32)

    q = x @ params["wq"] + params["bq"]
    k = x @ params["wk"] + params["bk"]
    v = x @ params["wv"] + params["bv"]
    scores = jnp.einsum("bsh,bth->bst", q, k) * scale
    scores = scores + (m[:, None, :] - 1.0) * 1e9
    p = jax.nn.softmax(scores, axis=-1)
    attn = jnp.einsum("bst,bth->bsh", p, v) @ params["wo"] + params["bo"]

    h = x + attn
    mu = h.mean(-1, keepdims=True)
    var = ((h - mu) ** 2).mean(-1, keepdims=True)
    hn = (h - mu) * lax.rsqrt(var + eps) * params["ln1g"] + params["ln1b"]

    ff = jax.nn.gelu(hn @ params["w1"] + params["b1"]) @ params["w2"] + params["b2"]
    h2 = hn + ff
    mu2 = h2.mean(-1, keepdims=True)
    var2 = ((h2 - mu2) ** 2).mean(-1, keepdims=True)
    hidden = (h2 - mu2) * lax.rsqrt(var2 + eps) * params["ln2g"] + params["ln2b"]

    masked = hidden * m[:, :, None]
    mean = masked.sum(axis=1) / m[:, :, None].sum(axis=1)
    return mean, hidden


if __name__ == "__main__":
    # Small, lane-dense shapes: batch=2, seq=16, hidden=128, ffn=256, 25 amino-acid tokens.
    B, S, H, F, V = 2, 16, 128, 256, 25

    key = jax.random.PRNGKey(0)
    keys = jax.random.split(key, 20)

    def w(i, shape, s=0.05):
        return s * jax.random.normal(keys[i], shape, jnp.float32)

    params = {
        "wq": w(0, (H, H)), "bq": w(1, (1, H), 0.02),
        "wk": w(2, (H, H)), "bk": w(3, (1, H), 0.02),
        "wv": w(4, (H, H)), "bv": w(5, (1, H), 0.02),
        "wo": w(6, (H, H)), "bo": w(7, (1, H), 0.02),
        "ln1g": 1.0 + w(8, (1, H), 0.05), "ln1b": w(9, (1, H), 0.02),
        "w1": w(10, (H, F)), "b1": w(11, (1, F), 0.02),
        "w2": w(12, (F, H)), "b2": w(13, (1, H), 0.02),
        "ln2g": 1.0 + w(14, (1, H), 0.05), "ln2b": w(15, (1, H), 0.02),
    }

    # Glue standing in for the HF tokenizer + embedding layer of the pretrained model:
    embed_table = 0.1 * jax.random.normal(keys[16], (V, H), jnp.float32)
    token_ids = jax.random.randint(keys[17], (B, S), 0, V)
    x = embed_table[token_ids]                                            # (B, S, H)

    lengths = jnp.array([11, 16], dtype=jnp.int32)                        # valid tokens per seq
    attention_mask = (jnp.arange(S)[None, :] < lengths[:, None]).astype(jnp.float32)  # (B, S)

    mean_emb, emb_repr = prot_encoder_pallas(x, attention_mask, params, tq=8)
    jax.block_until_ready((mean_emb, emb_repr))

    mean_ref, emb_ref = prot_encoder_ref(x, attention_mask, params)
    assert mean_emb.shape == (B, H) and emb_repr.shape == (B, S, H)
    # Tolerance covers bf16 MXU operands (f32 accumulation) + the approximate EUP reciprocal
    # in the softmax normalization.
    assert jnp.allclose(emb_repr, emb_ref, rtol=3e-2, atol=3e-2), "hidden-state mismatch"
    assert jnp.allclose(mean_emb, mean_ref, rtol=3e-2, atol=3e-2), "mean-pool mismatch"

    print("KERNEL_OK")
</pallas_src>

<mosaic_0001>
module attributes {stable_mosaic.version = 11 : i64} {
  func.func @_prot_encoder_kernel(%arg0: i32, %arg1: i32, %arg2: memref<1x8x128xf32, #tpu.memory_space<vmem>>, %arg3: memref<1x16x128xf32, #tpu.memory_space<vmem>>, %arg4: memref<1x1x16xf32, #tpu.memory_space<vmem>>, %arg5: memref<1x8x1xf32, #tpu.memory_space<vmem>>, %arg6: memref<128x384xbf16, #tpu.memory_space<vmem>>, %arg7: memref<1x384xf32, #tpu.memory_space<vmem>>, %arg8: memref<128x128xbf16, #tpu.memory_space<vmem>>, %arg9: memref<128x256xbf16, #tpu.memory_space<vmem>>, %arg10: memref<1x256xf32, #tpu.memory_space<vmem>>, %arg11: memref<256x128xbf16, #tpu.memory_space<vmem>>, %arg12: memref<6x128xf32, #tpu.memory_space<vmem>>, %arg13: memref<1x8x128xf32, #tpu.memory_space<vmem>>, %arg14: memref<1x1x128xf32, #tpu.memory_space<vmem>>, %arg15: memref<1x1xf32, #tpu.memory_space<vmem>>) attributes {dimension_semantics = [#tpu.dimension_semantics<parallel>, #tpu.dimension_semantics<arbitrary>], iteration_bounds = array<i64: 2, 2>, scalar_prefetch = 0 : i64, scratch_operands = 1 : i64, tpu.core_type = #tpu.core_type<tc>, window_params = [{transform_indices = @transform_0, window_bounds = array<i64: 1, 8, 128>}, {transform_indices = @transform_1, window_bounds = array<i64: 1, 16, 128>}, {transform_indices = @transform_2, window_bounds = array<i64: 1, 1, 16>}, {transform_indices = @transform_3, window_bounds = array<i64: 1, 8, 1>}, {pipeline_mode = #tpu.pipeline_mode<synchronous>, transform_indices = @transform_4, window_bounds = array<i64: 128, 384>}, {pipeline_mode = #tpu.pipeline_mode<synchronous>, transform_indices = @transform_5, window_bounds = array<i64: 1, 384>}, {pipeline_mode = #tpu.pipeline_mode<synchronous>, transform_indices = @transform_6, window_bounds = array<i64: 128, 128>}, {pipeline_mode = #tpu.pipeline_mode<synchronous>, transform_indices = @transform_7, window_bounds = array<i64: 128, 256>}, {pipeline_mode = #tpu.pipeline_mode<synchronous>, transform_indices = @transform_8, window_bounds = array<i64: 1, 256>}, {pipeline_mode = #tpu.pipeline_mode<synchronous>, transform_indices = @transform_9, window_bounds = array<i64: 256, 128>}, {pipeline_mode = #tpu.pipeline_mode<synchronous>, transform_indices = @transform_10, window_bounds = array<i64: 6, 128>}, {transform_indices = @transform_11, window_bounds = array<i64: 1, 8, 128>}, {transform_indices = @transform_12, window_bounds = array<i64: 1, 1, 128>}]} {
    %c0 = arith.constant 0 : index
    %c0_0 = arith.constant 0 : index
    %c0_1 = arith.constant 0 : index
    %0 = vector.load %arg2[%c0, %c0_0, %c0_1] : memref<1x8x128xf32, #tpu.memory_space<vmem>>, vector<1x8x128xf32>
    %1 = vector.shape_cast %0 : vector<1x8x128xf32> to vector<8x128xf32>
    %c0_2 = arith.constant 0 : index
    %c0_3 = arith.constant 0 : index
    %c0_4 = arith.constant 0 : index
    %2 = vector.load %arg3[%c0_2, %c0_3, %c0_4] : memref<1x16x128xf32, #tpu.memory_space<vmem>>, vector<1x16x128xf32>
    %3 = vector.shape_cast %2 : vector<1x16x128xf32> to vector<16x128xf32>
    %4 = arith.truncf %1 : vector<8x128xf32> to vector<8x128xbf16>
    %5 = arith.truncf %3 : vector<16x128xf32> to vector<16x128xbf16>
    %c0_5 = arith.constant 0 : index
    %c0_6 = arith.constant 0 : index
    %6 = vector.load %arg6[%c0_5, %c0_6] : memref<128x384xbf16, #tpu.memory_space<vmem>>, vector<128x128xbf16>
    %cst = arith.constant dense<0.000000e+00> : vector<8x128xf32>
    %7 = tpu.matmul %4, %6, %cst {dimension_numbers = #tpu.dot_dimension_numbers<[1], [0], [0], [1], [0, 0, 1, 1], [], []>} : vector<8x128xbf16>, vector<128x128xbf16>, vector<8x128xf32> -> vector<8x128xf32>
    %c0_7 = arith.constant 0 : index
    %c0_8 = arith.constant 0 : index
    %8 = vector.load %arg7[%c0_7, %c0_8] : memref<1x384xf32, #tpu.memory_space<vmem>>, vector<1x128xf32>
    %9 = vector.broadcast %8 : vector<1x128xf32> to vector<8x128xf32>
    %10 = arith.addf %7, %9 : vector<8x128xf32>
    %c0_9 = arith.constant 0 : index
    %c128 = arith.constant 128 : index
    %11 = vector.load %arg6[%c0_9, %c128] : memref<128x384xbf16, #tpu.memory_space<vmem>>, vector<128x128xbf16>
    %cst_10 = arith.constant dense<0.000000e+00> : vector<16x128xf32>
    %12 = tpu.matmul %5, %11, %cst_10 {dimension_numbers = #tpu.dot_dimension_numbers<[1], [0], [0], [1], [0, 0, 1, 1], [], []>} : vector<16x128xbf16>, vector<128x128xbf16>, vector<16x128xf32> -> vector<16x128xf32>
    %c0_11 = arith.constant 0 : index
    %c128_12 = arith.constant 128 : index
    %13 = vector.load %arg7[%c0_11, %c128_12] : memref<1x384xf32, #tpu.memory_space<vmem>>, vector<1x128xf32>
    %14 = vector.broadcast %13 : vector<1x128xf32> to vector<16x128xf32>
    %15 = arith.addf %12, %14 : vector<16x128xf32>
    %c0_13 = arith.constant 0 : index
    %c256 = arith.constant 256 : index
    %16 = vector.load %arg6[%c0_13, %c256] : memref<128x384xbf16, #tpu.memory_space<vmem>>, vector<128x128xbf16>
    %cst_14 = arith.constant dense<0.000000e+00> : vector<16x128xf32>
    %17 = tpu.matmul %5, %16, %cst_14 {dimension_numbers = #tpu.dot_dimension_numbers<[1], [0], [0], [1], [0, 0, 1, 1], [], []>} : vector<16x128xbf16>, vector<128x128xbf16>, vector<16x128xf32> -> vector<16x128xf32>
    %c0_15 = arith.constant 0 : index
    %c256_16 = arith.constant 256 : index
    %18 = vector.load %arg7[%c0_15, %c256_16] : memref<1x384xf32, #tpu.memory_space<vmem>>, vector<1x128xf32>
    %19 = vector.broadcast %18 : vector<1x128xf32> to vector<16x128xf32>
    %20 = arith.addf %17, %19 : vector<16x128xf32>
    %21 = arith.truncf %10 : vector<8x128xf32> to vector<8x128xbf16>
    %22 = arith.truncf %15 : vector<16x128xf32> to vector<16x128xbf16>
    %cst_17 = arith.constant dense<0.000000e+00> : vector<8x16xf32>
    %23 = tpu.matmul %21, %22, %cst_17 {dimension_numbers = #tpu.dot_dimension_numbers<[1], [1], [0], [0], [0, 0, 1, 0], [], []>} : vector<8x128xbf16>, vector<16x128xbf16>, vector<8x16xf32> -> vector<8x16xf32>
    %cst_18 = arith.constant 0.0883883461 : f32
    %24 = vector.broadcast %cst_18 : f32 to vector<8x16xf32>
    %25 = arith.mulf %23, %24 : vector<8x16xf32>
    %c0_19 = arith.constant 0 : index
    %c0_20 = arith.constant 0 : index
    %c0_21 = arith.constant 0 : index
    %26 = vector.load %arg4[%c0_19, %c0_20, %c0_21] : memref<1x1x16xf32, #tpu.memory_space<vmem>>, vector<1x1x16xf32>
    %27 = vector.shape_cast %26 : vector<1x1x16xf32> to vector<1x16xf32>
    %cst_22 = arith.constant 1.000000e+00 : f32
    %28 = vector.broadcast %cst_22 : f32 to vector<1x16xf32>
    %29 = arith.subf %27, %28 : vector<1x16xf32>
    %cst_23 = arith.constant 1.000000e+09 : f32
    %30 = vector.broadcast %cst_23 : f32 to vector<1x16xf32>
    %31 = arith.mulf %29, %30 : vector<1x16xf32>
    %32 = vector.broadcast %31 : vector<1x16xf32> to vector<8x16xf32>
    %33 = arith.addf %25, %32 : vector<8x16xf32>
    %cst_24 = arith.constant dense<0xFF800000> : vector<8xf32>
    %34 = vector.multi_reduction <maximumf>, %33, %cst_24 [1] : vector<8x16xf32> to vector<8xf32>
    %35 = vector.shape_cast %34 : vector<8xf32> to vector<8x1xf32>
    %36 = vector.broadcast %35 : vector<8x1xf32> to vector<8x16xf32>
    %37 = arith.subf %33, %36 : vector<8x16xf32>
    %38 = math.exp %37 : vector<8x16xf32>
    %cst_25 = arith.constant dense<0.000000e+00> : vector<8xf32>
    %39 = vector.multi_reduction <add>, %38, %cst_25 [1] : vector<8x16xf32> to vector<8xf32>
    %40 = vector.shape_cast %39 : vector<8xf32> to vector<8x1xf32>
    %41 = tpu.reciprocal %40 {approx = true} : vector<8x1xf32> -> vector<8x1xf32>
    %42 = vector.broadcast %41 : vector<8x1xf32> to vector<8x16xf32>
    %43 = arith.mulf %38, %42 : vector<8x16xf32>
    %44 = arith.truncf %43 : vector<8x16xf32> to vector<8x16xbf16>
    %45 = arith.truncf %20 : vector<16x128xf32> to vector<16x128xbf16>
    %cst_26 = arith.constant dense<0.000000e+00> : vector<8x128xf32>
    %46 = tpu.matmul %44, %45, %cst_26 {dimension_numbers = #tpu.dot_dimension_numbers<[1], [0], [0], [1], [0, 0, 1, 1], [], []>} : vector<8x16xbf16>, vector<16x128xbf16>, vector<8x128xf32> -> vector<8x128xf32>
    %47 = arith.truncf %46 : vector<8x128xf32> to vector<8x128xbf16>
    %c0_27 = arith.constant 0 : index
    %c0_28 = arith.constant 0 : index
    %48 = vector.load %arg8[%c0_27, %c0_28] : memref<128x128xbf16, #tpu.memory_space<vmem>>, vector<128x128xbf16>
    %cst_29 = arith.constant dense<0.000000e+00> : vector<8x128xf32>
    %49 = tpu.matmul %47, %48, %cst_29 {dimension_numbers = #tpu.dot_dimension_numbers<[1], [0], [0], [1], [0, 0, 1, 1], [], []>} : vector<8x128xbf16>, vector<128x128xbf16>, vector<8x128xf32> -> vector<8x128xf32>
    %c0_30 = arith.constant 0 : index
    %c0_31 = arith.constant 0 : index
    %50 = vector.load %arg12[%c0_30, %c0_31] : memref<6x128xf32, #tpu.memory_space<vmem>>, vector<1x128xf32>
    %51 = vector.broadcast %50 : vector<1x128xf32> to vector<8x128xf32>
    %52 = arith.addf %49, %51 : vector<8x128xf32>
    %53 = arith.addf %1, %52 : vector<8x128xf32>
    %cst_32 = arith.constant dense<0.000000e+00> : vector<8xf32>
    %54 = vector.multi_reduction <add>, %53, %cst_32 [1] : vector<8x128xf32> to vector<8xf32>
    %55 = vector.shape_cast %54 : vector<8xf32> to vector<8x1xf32>
    %cst_33 = arith.constant 1.280000e+02 : f32
    %56 = vector.broadcast %cst_33 : f32 to vector<8x1xf32>
    %57 = arith.divf %55, %56 : vector<8x1xf32>
    %58 = vector.broadcast %57 : vector<8x1xf32> to vector<8x128xf32>
    %59 = arith.subf %53, %58 : vector<8x128xf32>
    %60 = arith.mulf %59, %59 : vector<8x128xf32>
    %cst_34 = arith.constant dense<0.000000e+00> : vector<8xf32>
    %61 = vector.multi_reduction <add>, %60, %cst_34 [1] : vector<8x128xf32> to vector<8xf32>
    %62 = vector.shape_cast %61 : vector<8xf32> to vector<8x1xf32>
    %cst_35 = arith.constant 1.280000e+02 : f32
    %63 = vector.broadcast %cst_35 : f32 to vector<8x1xf32>
    %64 = arith.divf %62, %63 : vector<8x1xf32>
    %65 = vector.broadcast %57 : vector<8x1xf32> to vector<8x128xf32>
    %66 = arith.subf %53, %65 : vector<8x128xf32>
    %cst_36 = arith.constant 9.99999974E-6 : f32
    %67 = vector.broadcast %cst_36 : f32 to vector<8x1xf32>
    %68 = arith.addf %64, %67 : vector<8x1xf32>
    %69 = math.rsqrt %68 : vector<8x1xf32>
    %70 = vector.broadcast %69 : vector<8x1xf32> to vector<8x128xf32>
    %71 = arith.mulf %66, %70 : vector<8x128xf32>
    %c1 = arith.constant 1 : index
    %c0_37 = arith.constant 0 : index
    %72 = vector.load %arg12[%c1, %c0_37] : memref<6x128xf32, #tpu.memory_space<vmem>>, vector<1x128xf32>
    %73 = vector.broadcast %72 : vector<1x128xf32> to vector<8x128xf32>
    %74 = arith.mulf %71, %73 : vector<8x128xf32>
    %c2 = arith.constant 2 : index
    %c0_38 = arith.constant 0 : index
    %75 = vector.load %arg12[%c2, %c0_38] : memref<6x128xf32, #tpu.memory_space<vmem>>, vector<1x128xf32>
    %76 = vector.broadcast %75 : vector<1x128xf32> to vector<8x128xf32>
    %77 = arith.addf %74, %76 : vector<8x128xf32>
    %78 = arith.truncf %77 : vector<8x128xf32> to vector<8x128xbf16>
    %c0_39 = arith.constant 0 : index
    %c0_40 = arith.constant 0 : index
    %79 = vector.load %arg9[%c0_39, %c0_40] : memref<128x256xbf16, #tpu.memory_space<vmem>>, vector<128x256xbf16>
    %cst_41 = arith.constant dense<0.000000e+00> : vector<8x256xf32>
    %80 = tpu.matmul %78, %79, %cst_41 {dimension_numbers = #tpu.dot_dimension_numbers<[1], [0], [0], [1], [0, 0, 1, 1], [], []>} : vector<8x128xbf16>, vector<128x256xbf16>, vector<8x256xf32> -> vector<8x256xf32>
    %c0_42 = arith.constant 0 : index
    %c0_43 = arith.constant 0 : index
    %81 = vector.load %arg10[%c0_42, %c0_43] : memref<1x256xf32, #tpu.memory_space<vmem>>, vector<1x256xf32>
    %82 = vector.broadcast %81 : vector<1x256xf32> to vector<8x256xf32>
    %83 = arith.addf %80, %82 : vector<8x256xf32>
    %84 = arith.mulf %83, %83 : vector<8x256xf32>
    %85 = arith.mulf %83, %84 : vector<8x256xf32>
    %cst_44 = arith.constant 4.471500e-02 : f32
    %86 = vector.broadcast %cst_44 : f32 to vector<8x256xf32>
    %87 = arith.mulf %86, %85 : vector<8x256xf32>
    %88 = arith.addf %83, %87 : vector<8x256xf32>
    %cst_45 = arith.constant 0.797884583 : f32
    %89 = vector.broadcast %cst_45 : f32 to vector<8x256xf32>
    %90 = arith.mulf %89, %88 : vector<8x256xf32>
    %91 = math.tanh %90 : vector<8x256xf32>
    %cst_46 = arith.constant 1.000000e+00 : f32
    %92 = vector.broadcast %cst_46 : f32 to vector<8x256xf32>
    %93 = arith.addf %92, %91 : vector<8x256xf32>
    %cst_47 = arith.constant 5.000000e-01 : f32
    %94 = vector.broadcast %cst_47 : f32 to vector<8x256xf32>
    %95 = arith.mulf %94, %93 : vector<8x256xf32>
    %96 = arith.mulf %83, %95 : vector<8x256xf32>
    %97 = arith.truncf %96 : vector<8x256xf32> to vector<8x256xbf16>
    %c0_48 = arith.constant 0 : index
    %c0_49 = arith.constant 0 : index
    %98 = vector.load %arg11[%c0_48, %c0_49] : memref<256x128xbf16, #tpu.memory_space<vmem>>, vector<256x128xbf16>
    %cst_50 = arith.constant dense<0.000000e+00> : vector<8x128xf32>
    %99 = tpu.matmul %97, %98, %cst_50 {dimension_numbers = #tpu.dot_dimension_numbers<[1], [0], [0], [1], [0, 0, 1, 1], [], []>} : vector<8x256xbf16>, vector<256x128xbf16>, vector<8x128xf32> -> vector<8x128xf32>
    %c3 = arith.constant 3 : index
    %c0_51 = arith.constant 0 : index
    %100 = vector.load %arg12[%c3, %c0_51] : memref<6x128xf32, #tpu.memory_space<vmem>>, vector<1x128xf32>
    %101 = vector.broadcast %100 : vector<1x128xf32> to vector<8x128xf32>
    %102 = arith.addf %99, %101 : vector<8x128xf32>
    %103 = arith.addf %77, %102 : vector<8x128xf32>
    %cst_52 = arith.constant dense<0.000000e+00> : vector<8xf32>
    %104 = vector.multi_reduction <add>, %103, %cst_52 [1] : vector<8x128xf32> to vector<8xf32>
    %105 = vector.shape_cast %104 : vector<8xf32> to vector<8x1xf32>
    %cst_53 = arith.constant 1.280000e+02 : f32
    %106 = vector.broadcast %cst_53 : f32 to vector<8x1xf32>
    %107 = arith.divf %105, %106 : vector<8x1xf32>
    %108 = vector.broadcast %107 : vector<8x1xf32> to vector<8x128xf32>
    %109 = arith.subf %103, %108 : vector<8x128xf32>
    %110 = arith.mulf %109, %109 : vector<8x128xf32>
    %cst_54 = arith.constant dense<0.000000e+00> : vector<8xf32>
    %111 = vector.multi_reduction <add>, %110, %cst_54 [1] : vector<8x128xf32> to vector<8xf32>
    %112 = vector.shape_cast %111 : vector<8xf32> to vector<8x1xf32>
    %cst_55 = arith.constant 1.280000e+02 : f32
    %113 = vector.broadcast %cst_55 : f32 to vector<8x1xf32>
    %114 = arith.divf %112, %113 : vector<8x1xf32>
    %115 = vector.broadcast %107 : vector<8x1xf32> to vector<8x128xf32>
    %116 = arith.subf %103, %115 : vector<8x128xf32>
    %cst_56 = arith.constant 9.99999974E-6 : f32
    %117 = vector.broadcast %cst_56 : f32 to vector<8x1xf32>
    %118 = arith.addf %114, %117 : vector<8x1xf32>
    %119 = math.rsqrt %118 : vector<8x1xf32>
    %120 = vector.broadcast %119 : vector<8x1xf32> to vector<8x128xf32>
    %121 = arith.mulf %116, %120 : vector<8x128xf32>
    %c4 = arith.constant 4 : index
    %c0_57 = arith.constant 0 : index
    %122 = vector.load %arg12[%c4, %c0_57] : memref<6x128xf32, #tpu.memory_space<vmem>>, vector<1x128xf32>
    %123 = vector.broadcast %122 : vector<1x128xf32> to vector<8x128xf32>
    %124 = arith.mulf %121, %123 : vector<8x128xf32>
    %c5 = arith.constant 5 : index
    %c0_58 = arith.constant 0 : index
    %125 = vector.load %arg12[%c5, %c0_58] : memref<6x128xf32, #tpu.memory_space<vmem>>, vector<1x128xf32>
    %126 = vector.broadcast %125 : vector<1x128xf32> to vector<8x128xf32>
    %127 = arith.addf %124, %126 : vector<8x128xf32>
    %c0_59 = arith.constant 0 : index
    %c0_60 = arith.constant 0 : index
    %c0_61 = arith.constant 0 : index
    %128 = vector.load %arg13[%c0_59, %c0_60, %c0_61] : memref<1x8x128xf32, #tpu.memory_space<vmem>>, vector<1x8x128xf32>
    %129 = vector.shape_cast %128 : vector<1x8x128xf32> to vector<8x128xf32>
    %130 = vector.shape_cast %127 : vector<8x128xf32> to vector<1x8x128xf32>
    tpu.vector_store %arg13[%c0_59, %c0_60, %c0_61], %130 {strides = array<i32>} : memref<1x8x128xf32, #tpu.memory_space<vmem>>, vector<1x8x128xf32>,
    %c0_i32 = arith.constant 0 : i32
    %131 = arith.cmpi eq, %arg1, %c0_i32 : i32
    %132 = arith.extui %131 : i1 to i32
    %c0_i32_62 = arith.constant 0 : i32
    %133 = arith.cmpi ne, %132, %c0_i32_62 : i32
    scf.if %133 {
      %cst_79 = arith.constant 0.000000e+00 : f32
      %157 = vector.broadcast %cst_79 : f32 to vector<1x128xf32>
      %c0_80 = arith.constant 0 : index
      %c0_81 = arith.constant 0 : index
      %c0_82 = arith.constant 0 : index
      %158 = vector.load %arg14[%c0_80, %c0_81, %c0_82] : memref<1x1x128xf32, #tpu.memory_space<vmem>>, vector<1x1x128xf32>
      %159 = vector.shape_cast %158 : vector<1x1x128xf32> to vector<1x128xf32>
      %160 = vector.shape_cast %157 : vector<1x128xf32> to vector<1x1x128xf32>
      tpu.vector_store %arg14[%c0_80, %c0_81, %c0_82], %160 {strides = array<i32>} : memref<1x1x128xf32, #tpu.memory_space<vmem>>, vector<1x1x128xf32>,
      %cst_83 = arith.constant 0.000000e+00 : f32
      %161 = vector.broadcast %cst_83 : f32 to vector<1x1xf32>
      %c0_84 = arith.constant 0 : index
      %c0_85 = arith.constant 0 : index
      %162 = vector.load %arg15[%c0_84, %c0_85] : memref<1x1xf32, #tpu.memory_space<vmem>>, vector<1x1xf32>
      tpu.vector_store %arg15[%c0_84, %c0_85], %161 {strides = array<i32>} : memref<1x1xf32, #tpu.memory_space<vmem>>, vector<1x1xf32>,
    } else {
    }
    %c0_63 = arith.constant 0 : index
    %c0_64 = arith.constant 0 : index
    %c0_65 = arith.constant 0 : index
    %134 = vector.load %arg5[%c0_63, %c0_64, %c0_65] : memref<1x8x1xf32, #tpu.memory_space<vmem>>, vector<1x8x1xf32>
    %135 = vector.shape_cast %134 : vector<1x8x1xf32> to vector<8x1xf32>
    %c0_66 = arith.constant 0 : index
    %c0_67 = arith.constant 0 : index
    %c0_68 = arith.constant 0 : index
    %136 = vector.load %arg14[%c0_66, %c0_67, %c0_68] : memref<1x1x128xf32, #tpu.memory_space<vmem>>, vector<1x1x128xf32>
    %137 = vector.shape_cast %136 : vector<1x1x128xf32> to vector<1x128xf32>
    %138 = vector.broadcast %135 : vector<8x1xf32> to vector<8x128xf32>
    %139 = arith.mulf %127, %138 : vector<8x128xf32>
    %cst_69 = arith.constant dense<0.000000e+00> : vector<128xf32>
    %140 = vector.multi_reduction <add>, %139, %cst_69 [0] : vector<8x128xf32> to vector<128xf32>
    %141 = vector.shape_cast %140 : vector<128xf32> to vector<1x128xf32>
    %142 = arith.addf %137, %141 : vector<1x128xf32>
    %c0_70 = arith.constant 0 : index
    %c0_71 = arith.constant 0 : index
    %c0_72 = arith.constant 0 : index
    %143 = vector.load %arg14[%c0_70, %c0_71, %c0_72] : memref<1x1x128xf32, #tpu.memory_space<vmem>>, vector<1x1x128xf32>
    %144 = vector.shape_cast %143 : vector<1x1x128xf32> to vector<1x128xf32>
    %145 = vector.shape_cast %142 : vector<1x128xf32> to vector<1x1x128xf32>
    tpu.vector_store %arg14[%c0_70, %c0_71, %c0_72], %145 {strides = array<i32>} : memref<1x1x128xf32, #tpu.memory_space<vmem>>, vector<1x1x128xf32>,
    %c0_73 = arith.constant 0 : index
    %c0_74 = arith.constant 0 : index
    %146 = vector.load %arg15[%c0_73, %c0_74] : memref<1x1xf32, #tpu.memory_space<vmem>>, vector<1x1xf32>
    %147 = vector.shape_cast %135 : vector<8x1xf32> to vector<1x8x1xf32>
    %cst_75 = arith.constant dense<0.000000e+00> : vector<1xf32>
    %148 = vector.multi_reduction <add>, %147, %cst_75 [1, 2] : vector<1x8x1xf32> to vector<1xf32>
    %149 = vector.shape_cast %148 : vector<1xf32> to vector<1x1x1xf32>
    %150 = vector.extract %149[0, 0, 0] : f32 from vector<1x1x1xf32>
    %151 = vector.broadcast %150 : f32 to vector<1x1xf32>
    %152 = arith.addf %146, %151 : vector<1x1xf32>
    %c0_76 = arith.constant 0 : index
    %c0_77 = arith.constant 0 : index
    %153 = vector.load %arg15[%c0_76, %c0_77] : memref<1x1xf32, #tpu.memory_space<vmem>>, vector<1x1xf32>
    tpu.vector_store %arg15[%c0_76, %c0_77], %152 {strides = array<i32>} : memref<1x1xf32, #tpu.memory_space<vmem>>, vector<1x1xf32>,
    %c1_i32 = arith.constant 1 : i32
    %154 = arith.cmpi eq, %arg1, %c1_i32 : i32
    %155 = arith.extui %154 : i1 to i32
    %c0_i32_78 = arith.constant 0 : i32
    %156 = arith.cmpi ne, %155, %c0_i32_78 : i32
    scf.if %156 {
      %c0_79 = arith.constant 0 : index
      %c0_80 = arith.constant 0 : index
      %c0_81 = arith.constant 0 : index
      %157 = vector.load %arg14[%c0_79, %c0_80, %c0_81] : memref<1x1x128xf32, #tpu.memory_space<vmem>>, vector<1x1x128xf32>
      %158 = vector.shape_cast %157 : vector<1x1x128xf32> to vector<1x128xf32>
      %c0_82 = arith.constant 0 : index
      %c0_83 = arith.constant 0 : index
      %159 = vector.load %arg15[%c0_82, %c0_83] : memref<1x1xf32, #tpu.memory_space<vmem>>, vector<1x1xf32>
      %cst_84 = arith.constant 1.000000e+00 : f32
      %160 = vector.broadcast %cst_84 : f32 to vector<1x1xf32>
      %161 = arith.maximumf %159, %160 : vector<1x1xf32>
      %162 = vector.broadcast %161 : vector<1x1xf32> to vector<1x128xf32>
      %163 = arith.divf %158, %162 : vector<1x128xf32>
      %c0_85 = arith.constant 0 : index
      %c0_86 = arith.constant 0 : index
      %c0_87 = arith.constant 0 : index
      %164 = vector.load %arg14[%c0_85, %c0_86, %c0_87] : memref<1x1x128xf32, #tpu.memory_space<vmem>>, vector<1x1x128xf32>
      %165 = vector.shape_cast %164 : vector<1x1x128xf32> to vector<1x128xf32>
      %166 = vector.shape_cast %163 : vector<1x128xf32> to vector<1x1x128xf32>
      tpu.vector_store %arg14[%c0_85, %c0_86, %c0_87], %166 {strides = array<i32>} : memref<1x1x128xf32, #tpu.memory_space<vmem>>, vector<1x1x128xf32>,
    } else {
    }
    return
  }
  func.func @transform_0(%arg0: i32, %arg1: i32) -> (i32, i32, i32) {
    %c0_i32 = arith.constant 0 : i32
    %c0_i32_0 = arith.constant 0 : i32
    return %arg0, %arg1, %c0_i32 : i32, i32, i32
  }
  func.func @transform_1(%arg0: i32, %arg1: i32) -> (i32, i32, i32) {
    %c0_i32 = arith.constant 0 : i32
    %c0_i32_0 = arith.constant 0 : i32
    %c0_i32_1 = arith.constant 0 : i32
    return %arg0, %c0_i32, %c0_i32_0 : i32, i32, i32
  }
  func.func @transform_2(%arg0: i32, %arg1: i32) -> (i32, i32, i32) {
    %c0_i32 = arith.constant 0 : i32
    %c0_i32_0 = arith.constant 0 : i32
    %c0_i32_1 = arith.constant 0 : i32
    return %arg0, %c0_i32, %c0_i32_0 : i32, i32, i32
  }
  func.func @transform_3(%arg0: i32, %arg1: i32) -> (i32, i32, i32) {
    %c0_i32 = arith.constant 0 : i32
    %c0_i32_0 = arith.constant 0 : i32
    return %arg0, %arg1, %c0_i32 : i32, i32, i32
  }
  func.func @transform_4(%arg0: i32, %arg1: i32) -> (i32, i32) {
    %c0_i32 = arith.constant 0 : i32
    %c0_i32_0 = arith.constant 0 : i32
    %c0_i32_1 = arith.constant 0 : i32
    return %c0_i32, %c0_i32_0 : i32, i32
  }
  func.func @transform_5(%arg0: i32, %arg1: i32) -> (i32, i32) {
    %c0_i32 = arith.constant 0 : i32
    %c0_i32_0 = arith.constant 0 : i32
    %c0_i32_1 = arith.constant 0 : i32
    return %c0_i32, %c0_i32_0 : i32, i32
  }
  func.func @transform_6(%arg0: i32, %arg1: i32) -> (i32, i32) {
    %c0_i32 = arith.constant 0 : i32
    %c0_i32_0 = arith.constant 0 : i32
    %c0_i32_1 = arith.constant 0 : i32
    return %c0_i32, %c0_i32_0 : i32, i32
  }
  func.func @transform_7(%arg0: i32, %arg1: i32) -> (i32, i32) {
    %c0_i32 = arith.constant 0 : i32
    %c0_i32_0 = arith.constant 0 : i32
    %c0_i32_1 = arith.constant 0 : i32
    return %c0_i32, %c0_i32_0 : i32, i32
  }
  func.func @transform_8(%arg0: i32, %arg1: i32) -> (i32, i32) {
    %c0_i32 = arith.constant 0 : i32
    %c0_i32_0 = arith.constant 0 : i32
    %c0_i32_1 = arith.constant 0 : i32
    return %c0_i32, %c0_i32_0 : i32, i32
  }
  func.func @transform_9(%arg0: i32, %arg1: i32) -> (i32, i32) {
    %c0_i32 = arith.constant 0 : i32
    %c0_i32_0 = arith.constant 0 : i32
    %c0_i32_1 = arith.constant 0 : i32
    return %c0_i32, %c0_i32_0 : i32, i32
  }
  func.func @transform_10(%arg0: i32, %arg1: i32) -> (i32, i32) {
    %c0_i32 = arith.constant 0 : i32
    %c0_i32_0 = arith.constant 0 : i32
    %c0_i32_1 = arith.constant 0 : i32
    return %c0_i32, %c0_i32_0 : i32, i32
  }
  func.func @transform_11(%arg0: i32, %arg1: i32) -> (i32, i32, i32) {
    %c0_i32 = arith.constant 0 : i32
    %c0_i32_0 = arith.constant 0 : i32
    return %arg0, %arg1, %c0_i32 : i32, i32, i32
  }
  func.func @transform_12(%arg0: i32, %arg1: i32) -> (i32, i32, i32) {
    %c0_i32 = arith.constant 0 : i32
    %c0_i32_0 = arith.constant 0 : i32
    %c0_i32_1 = arith.constant 0 : i32
    return %arg0, %c0_i32, %c0_i32_0 : i32, i32, i32
  }
}

</mosaic_0001>

<bundles_post_ra>
// kernel: tpu_custom_call.1
= control target key start
LH: loop header
LB: loop body
LE: loop exit
PB: predicated region body
PF: predicated region fallthrough
CT: control target
= control target key end

     0   :  { %s3256_s0 = inlined_call_operand.vmem [shape: f32[2,16,128], index: 0, kind: input, shape index: {}]   ;;  %s3257_s1 = inlined_call_operand.hbm [shape: f32[2,16,128], index: 1, kind: input, shape index: {}]   ;;  %s3258_s2 = inlined_call_operand.hbm [shape: f32[2,1,16], index: 2, kind: input, shape index: {}]   ;;  %s3259_s3 = inlined_call_operand.vmem [shape: f32[2,16,1], index: 3, kind: input, shape index: {}]   ;;  %s3260_s4 = inlined_call_operand.hbm [shape: bf16[128,384], index: 4, kind: input, shape index: {}]   ;;  %s3261_s5 = inlined_call_operand.vmem [shape: f32[1,384], index: 5, kind: input, shape index: {}]   ;;  %s3262_s6 = inlined_call_operand.hbm [shape: bf16[128,128], index: 6, kind: input, shape index: {}]   ;;  %s3263_s7 = inlined_call_operand.hbm [shape: bf16[128,256], index: 7, kind: input, shape index: {}]   ;;  %s3264_s8 = inlined_call_operand.vmem [shape: f32[1,256], index: 8, kind: input, shape index: {}]   ;;  %s3265_s9 = inlined_call_operand.hbm [shape: bf16[256,128], index: 9, kind: input, shape index: {}]   ;;  %s3266_s10 = inlined_call_operand.vmem [shape: f32[6,128], index: 10, kind: input, shape index: {}]   ;;  %s3267_s11 = inlined_call_operand.hbm [shape: f32[2,16,128], index: 11, kind: output, shape index: {0}]   ;;  %s3268_s12 = inlined_call_operand.hbm [shape: f32[2,1,128], index: 12, kind: output, shape index: {1}]  }
   0x1   :  { %3293 = sst [smem:[#allocation36_spill]] %s3256_s0 }
   0x2   :  { %3294 = sst [smem:[#allocation37_spill]] %s3257_s1 }
   0x3   :  { %3295 = sst [smem:[#allocation38_spill]] %s3260_s4 }
   0x4   :  { %3296 = sst [smem:[#allocation39_spill]] %s3261_s5 }
   0x5   :  { %3297 = sst [smem:[#allocation40_spill]] %s3262_s6 }
   0x6   :  { %3298 = sst [smem:[#allocation41_spill]] %s3263_s7 }
   0x7   :  { %3299 = sst [smem:[#allocation42_spill]] %s3264_s8 }
   0x8   :  { %3300 = sst [smem:[#allocation43_spill]] %s3265_s9 }
   0x9   :  { %3301 = sst [smem:[#allocation44_spill]] %s3266_s10 }
   0xa   :  { %3302 = sst [smem:[#allocation45_spill]] %s3267_s11 }
   0xb   :  { %3303 = sst [smem:[#allocation46_spill]] %s3268_s12 }
   0xc   :  { %18 = vsyncpa [#allocation4], 0 }
   0xd   :  { %20 = vsyncpa [#allocation4 + $0x1], 0 }
   0xe   :  { %21 = vsyncpa [#allocation7], 0 }
   0xf   :  { %23 = vsyncpa [#allocation7 + $0x1], 0 }
  0x10   :  { %24 = vsyncpa [#allocation10], 0 }
  0x11   :  { %25 = vsyncpa [#allocation13], 0 }
  0x12   :  { %26 = vsyncpa [#allocation5], 0 }
  0x13   :  { %28 = vsyncpa [#allocation5 + $0x1], 0 }
  0x14   :  { %29 = vsyncpa [#allocation16], 0 }
  0x15   :  { %31 = vsyncpa [#allocation16 + $0x1], 0  ;;  %s2787_s21 = smov 0   ;;  %s2789_s22 = smov 0  }
  0x16   :  { %s2791_s23 = smov 0   ;;  %s2793_s24 = smov 0  }
  0x17   :  { %s2795_s25 = smov 0   ;;  %s2797_s26 = smov 0  }
  0x18   :  { %s2799_s27 = smov 0   ;;  %s2801_s28 = smov 0  }
  0x19   :  { %s2803_s29 = smov 0   ;;  %s2805_s30 = smov 0  }
  0x1a   :  { %s2807_s13 = smov 0  }
  0x1b LB: > { %3304 = sst [smem:[#allocation24_spill]] %s2661_s21  ;;  %s2843_s14 = sadd.s32 4294967295, %s2701_s13   ;;  %s2701_s13 = sphi %s2807_s13, %s37_s13   ;;  %s2697_s30 = sphi %s2805_s30, %s3370_s30   ;;  %s2693_s29 = sphi %s2803_s29, %s3363_s29   ;;  %s2689_s28 = sphi %s2801_s28, %s3369_s28   ;;  %s2685_s27 = sphi %s2799_s27, %s3362_s27   ;;  %s2681_s26 = sphi %s2797_s26, %s3361_s26   ;;  %s2677_s25 = sphi %s2795_s25, %s3368_s25   ;;  %s2673_s24 = sphi %s2793_s24, %s3367_s24   ;;  %s2669_s23 = sphi %s2791_s23, %s3366_s23   ;;  %s2665_s22 = sphi %s2789_s22, %s3365_s22   ;;  %s2661_s21 = sphi %s2787_s21, %s3359_s21  }
  0x1c   : > { %3305 = sst [smem:[#allocation25_spill]] %s2665_s22  ;;  %s1861_s15 = sadd.s32 4294967294, %s2701_s13  }
  0x1d   : > { %3306 = sst [smem:[#allocation26_spill]] %s2673_s24  ;;  %p97_p0 = scmp.ne.s32.totalorder %s2677_s25, %s2673_s24 }
  0x1e   : > { %3307 = sst [smem:[#allocation27_spill]] %s2681_s26  ;;  %p3280_p1 = scmp.eq.s32.totalorder %s2843_s14, 0 }
  0x1f   : > { %3308 = sst [smem:[#allocation28_spill]] %s2693_s29  ;;  %p323_p2 = scmp.ne.s32.totalorder %s2669_s23, %s2665_s22 }
  0x20   : > { %p2854_p3 = por %p3280_p1, %p97_p0  ;;  %p3274_p4 = scmp.eq.s32.totalorder %s2843_s14, 3 }
  0x21   : > { %p329_p5 = scmp.ne.s32.totalorder %s2665_s22, %s2661_s21  ;;  %p330_p6 = scmp.eq.s32.totalorder %s1861_s15, 3 }
  0x22   : > { %p2863_p7 = por %p3274_p4, %p323_p2  ;;  %p1862_p8 = scmp.ge.s32.totalorder %s2701_s13, 1 }
  0x23   : > { %p2868_p9 = por %p330_p6, %p329_p5  ;;  %p2872_p10 = por %p330_p6, %p97_p0 }
  0x24   : > { %s3310_s18 = scalar_select %p2863_p7, 1, 0 }
  0x25   : > { %s3312_s19 = scalar_select %p2868_p9, 1, 0 }
  0x26   : > { %3311 = sst [smem:[#allocation29_spill]] %s3310_s18  ;;  %p363_p11 = scmp.lt.s32.totalorder %s2701_s13, 5 }
  0x27   : > { %3313 = sst [smem:[#allocation30_spill]] %s3312_s19  ;;  %s2703_s15 = smov [#allocation8]  }
  0x28   : > { %s3314_s20 = scalar_select %p2872_p10, 1, 0 }
  0x29   : > { %p2877_p12 = pnand %p1862_p8, %p363_p11  ;;  %s375_s24 = sshll.u32 %s2703_s15, 4  ;;  %s376_s24 = int_to_ptr.vmem [resolvable:$true] %s375_s24 }
  0x2a   : > { %3315 = sst [smem:[#allocation31_spill]] %s3314_s20  ;;  %s2704_s19 = smov [#allocation9]  }
  0x2b   : > { %p2147_p13 = pneg %p2877_p12  ;;  %s391_s20 = sshll.u32 %s2704_s19, 4  ;;  %s392_s20 = int_to_ptr.vmem [resolvable:$true] %s391_s20 }
  0x2c   : > { %s2386_s12 = scalar_lea.vmem %s376_s24, 3072  ;;  %p2394_p11 = scmp.lt.s32.totalorder %s376_s24, %s376_s24 }
  0x2d   : > { %p2885_p2 = pnand %p2147_p13, %p3280_p1  ;;  %p2387_p5 = scmp.ne.s32.totalorder %s376_s24, %s2386_s12 }
  0x2e   : > { %p2395_p4 = scmp.lt.s32.totalorder %s2386_s12, %s2386_s12 }
  0x2f   : > { %p2377_p0 = pneg %p2885_p2 }
  0x30   : > { %p2396_p10 = por %p2395_p4, %p2394_p11 }
  0x31   : > { %p2389_p6 = pnand %p2387_p5, %p2377_p0 }
  0x33   : > { %p2390_p8 = pneg %p2389_p6 }
  0x35   : > { %p2397_p13 = pnand %p2396_p10, %p2390_p8 }
  0x37   : > { %2400 = shalt.err (!%p2397_p13)
}
  0x38   : > { %s2705_s15 = smov 192   ;;  %s2706_s11 = smov 12  }
  0x39   : > { %s3318_s4 = sld [smem:[#allocation38_spill]]  ;;  %s2412_s22 = scalar_lea.vmem %s392_s20, 1024 }
  0x3a   : > { %p2413_p1 = scmp.ne.s32.totalorder %s392_s20, %s2412_s22  ;;  %p2420_p9 = scmp.lt.s32.totalorder %s392_s20, %s392_s20 }
  0x3b   : > { %p2421_p7 = scmp.lt.s32.totalorder %s2412_s22, %s2412_s22 }
  0x3c   : > { %p2415_p5 = pnand %p2413_p1, %p2377_p0 }
  0x3d   : > { %p2422_p4 = por %p2421_p7, %p2420_p9 }
  0x3e   : > { %p2416_p6 = pneg %p2415_p5 }
  0x3f   : > { %2150 = dma.hbm_to_vmem [thread:$0]  (!%p2885_p2), %s3318_s4, 3072, %s376_s24, [#allocation7], %s2705_s15, %s2705_s15, %s2706_s11  }
  0x40   : > { %p2423_p10 = pnand %p2422_p4, %p2416_p6 }
  0x42   : > { %2426 = shalt.err (!%p2423_p10)
}
  0x43   : > { %s3282_s12 = smov 64   ;;  %s2708_s8 = smov 4  }
  0x44   : > { %s3319_s6 = sld [smem:[#allocation40_spill]]  ;;  %s2709_s18 = smov [#allocation11]  }
  0x45   : > { %s404_s15 = sshll.u32 %s2709_s18, 4  ;;  %s405_s15 = int_to_ptr.vmem [resolvable:$true] %s404_s15 }
  0x46   : > { %s2438_s19 = scalar_lea.vmem %s405_s15, 2048  ;;  %p2446_p8 = scmp.lt.s32.totalorder %s405_s15, %s405_s15 }
  0x47   : > { %p2439_p1 = scmp.ne.s32.totalorder %s405_s15, %s2438_s19  ;;  %p2447_p11 = scmp.lt.s32.totalorder %s2438_s19, %s2438_s19 }
  0x49   : > { %p2441_p7 = pnand %p2439_p1, %p2377_p0  ;;  %p2448_p13 = por %p2447_p11, %p2446_p8 }
  0x4a   : > { %2153 = dma.hbm_to_vmem [thread:$0]  (!%p2885_p2), %s3319_s6, 1024, %s392_s20, [#allocation10], %s3282_s12, %s3282_s12, %s2708_s8  }
  0x4b   : > { %p2442_p9 = pneg %p2441_p7 }
  0x4d   : > { %p2449_p5 = pnand %p2448_p13, %p2442_p9 }
  0x4f   : > { %2452 = shalt.err (!%p2449_p5)
}
  0x50   : > { %s3283_s22 = smov 128   ;;  %s3284_s4 = smov 8  }
  0x51   : > { %s3320_s7 = sld [smem:[#allocation41_spill]]  ;;  %s2712_s24 = smov [#allocation12]  }
  0x52   : > { %s420_s18 = sshll.u32 %s2712_s24, 4  ;;  %s421_s18 = int_to_ptr.vmem [resolvable:$true] %s420_s18 }
  0x53   : > { %s2464_s12 = scalar_lea.vmem %s421_s18, 2048  ;;  %p2472_p1 = scmp.lt.s32.totalorder %s421_s18, %s421_s18 }
  0x54   : > { %p2465_p6 = scmp.ne.s32.totalorder %s421_s18, %s2464_s12  ;;  %p2473_p7 = scmp.lt.s32.totalorder %s2464_s12, %s2464_s12 }
  0x56   : > { %p2467_p4 = pnand %p2465_p6, %p2377_p0  ;;  %p2474_p9 = por %p2473_p7, %p2472_p1 }
  0x57   : > { %2156 = dma.hbm_to_vmem [thread:$0]  (!%p2885_p2), %s3320_s7, 2048, %s405_s15, [#allocation10], %s3283_s22, %s3283_s22, %s3284_s4  }
  0x58   : > { %p2468_p10 = pneg %p2467_p4 }
  0x5a   : > { %p2475_p8 = pnand %p2474_p9, %p2468_p10 }
  0x5c   : > { %2478 = shalt.err (!%p2475_p8)
}
  0x5d   : > { %s3321_s19 = smov 64   ;;  %s3322_s9 = sld [smem:[#allocation43_spill]] }
  0x5e   : > { %s46_s21 = sadd.s32 1, %s2693_s29  ;;  %s49_s12 = sadd.s32 1, %s2697_s30 }
  0x5f   : > { %p47_p0 = scmp.ge.s32.totalorder %s46_s21, 2  ;;  %s84_s11 = sadd.s32 1, %s2681_s26 }
  0x60   : > { %p91_p11 = scmp.ne.s32.totalorder %s2681_s26, %s2677_s25  ;;  %p92_p13 = scmp.eq.s32.totalorder %s2701_s13, 0 }
  0x61   : > { %s3372_s21 = smov (%p47_p0, %s46_s21), 0  ;;  %s3374_s12 = smov (!%p47_p0, %s49_s12), %s2697_s30 }
  0x62   : > { %3323 = sst [smem:[#allocation32_spill]] %s3372_s21  ;;  %s309_s24 = ssub.s32 %s2693_s29, %s3372_s21 }
  0x63   : > { %2159 = dma.hbm_to_vmem [thread:$0]  (!%p2885_p2), %s3322_s9, 2048, %s421_s18, [#allocation13], %s3321_s19, %s3321_s19, %s2708_s8  }
  0x64   : > { %p51_p5 = scmp.ge.s32.totalorder %s3374_s12, 2  ;;  %p3324_p6 = scmp.eq.s32.totalorder %s2843_s14, 3 }
  0x65   : > { %p2949_p2 = por %p92_p13, %p91_p11  ;;  %p2178_p10 = scmp.lt.s32.totalorder %s2701_s13, 4 }
  0x66   : > { %p2945_p4 = por %p3324_p6, %p91_p11  ;;  %s3376_s12 = smov (%p51_p5, %s3374_s12), 0 }
  0x67   : > { %3328 = sst [smem:[#allocation34_spill]] %s3376_s12  ;;  %s2957_s19 = sand.u32 1, %s2681_s26  }
  0x68   : > { %s3325_s8 = scalar_select %p2945_p4, 1, 0 }
  0x69   : > { %s1966_s15 = sshll.u32 %s2697_s30, 8  ;;  %s81_s20 = ssub.s32 %s2697_s30, %s3376_s12 }
  0x6a   : > { %3326 = sst [smem:[#allocation33_spill]] %s3325_s8  ;;  %p82_p1 = scmp.eq.s32.totalorder %s81_s20, 0 }
  0x6b   : > { %s310_s22 = sor.u32 %s309_s24, %s81_s20  ;;  %s1868_s4 = sshll.u32 %s2957_s19, 4 }
  0x6c   : > { %p311_p7 = scmp.eq.s32.totalorder %s310_s22, 0  ;;  %s3330_s7 = sadd.s32 1, %s2669_s23 }
  0x6d   : > { %s2964_s6 = scalar_select %p82_p1, %s2681_s26, %s84_s11  }
  0x6e   : > { %s2969_s9 = scalar_select %p311_p7, %s2669_s23, %s3330_s7  }
  0x6f   : > { %3329 = sst [smem:[#allocation35_spill]] %s2964_s6  ;;  %s452_s10 = scalar_lea.vmem [#allocation3], %s1868_s4 }
  0x70   : > { %s3331_s1 = sld [smem:[#allocation37_spill]]  ;;  %s459_s5 = sshll.u32 %s452_s10, 4  ;;  %s460_s5 = int_to_ptr.vmem [resolvable:$true] %s459_s5 }
  0x71   : > { %p2978_p9 = pnand %p2178_p10, %p2949_p2  ;;  %s469_s22 = sand.u32 1, %s2701_s13  }
  0x72   : > { %s449_s11 = scalar_lea.sflag [#allocation4], %s2957_s19  ;;  %s2492_s7 = scalar_lea.vmem %s460_s5, 256 }
  0x73   : > { %p2481_p8 = pneg %p2978_p9  ;;  %p2493_p0 = scmp.ne.s32.totalorder %s460_s5, %s2492_s7 }
  0x74   : > { %s2713_s4 = smov [#allocation3]  }
  0x75   : > { %p2495_p11 = pnand %p2493_p0, %p2481_p8  ;;  %s2497_s10 = sshll.u32 %s2713_s4, 4  ;;  %s2498_s10 = int_to_ptr.vmem [resolvable:$false] %s2497_s10 }
  0x76   : > { %s458_s8 = scalar_lea.hbm %s3331_s1, %s1966_s15  ;;  %s2499_s29 = scalar_lea.vmem %s2498_s10, 512 }
  0x77   : > { %p2496_p13 = pneg %p2495_p11  ;;  %p2500_p5 = scmp.lt.s32.totalorder %s460_s5, %s2498_s10 }
  0x78   : > { %p2501_p6 = scmp.lt.s32.totalorder %s2499_s29, %s2492_s7 }
  0x7a   : > { %p2502_p2 = por %p2501_p6, %p2500_p5 }
  0x7c   : > { %p2503_p10 = pnand %p2502_p2, %p2496_p13 }
  0x7e   : > { %2506 = shalt.err (!%p2503_p10)
}
  0x7f   : > { %s3333_s21 = smov 8   ;;  %s3334_s24 = smov 128  }
  0x80   : > { %2163 = dma.hbm_to_vmem [thread:$0]  (!%p2978_p9), %s458_s8, 256, %s460_s5, %s449_s11, %s3334_s24, %s3334_s24, %s3333_s21  }
  0x81   : > { %s1871_s18 = sshll.u32 %s2697_s30, 4  ;;  %s472_s1 = scalar_lea.vmem [#allocation6], %s2957_s19 }
  0x82   : > { %s477_s4 = scalar_lea.hbm %s3258_s2, %s1871_s18  ;;  %s479_s10 = sshll.u32 %s472_s1, 4  ;;  %s480_s10 = int_to_ptr.vmem [resolvable:$true] %s479_s10 }
  0x83   : > { %s470_s7 = scalar_lea.sflag [#allocation7], %s469_s22  ;;  %s2520_s29 = scalar_lea.vmem %s480_s10, 16 }
  0x84   : > { %p2521_p1 = scmp.ne.s32.totalorder %s480_s10, %s2520_s29  ;;  %s2714_s12 = smov [#allocation6]  }
  0x85   : > { %s2525_s6 = sshll.u32 %s2714_s12, 4  ;;  %s2526_s6 = int_to_ptr.vmem [resolvable:$false] %s2525_s6 }
  0x86   : > { %p2523_p7 = pnand %p2521_p1, %p2481_p8  ;;  %s2527_s26 = scalar_lea.vmem %s2526_s6, 32 }
  0x87   : > { %p2528_p11 = scmp.lt.s32.totalorder %s480_s10, %s2526_s6  ;;  %p2529_p13 = scmp.lt.s32.totalorder %s2527_s26, %s2520_s29 }
  0x88   : > { %p2524_p0 = pneg %p2523_p7 }
  0x89   : > { %p2530_p5 = por %p2529_p13, %p2528_p11 }
  0x8b   : > { %p2531_p6 = pnand %p2530_p5, %p2524_p0 }
  0x8d   : > { %2534 = shalt.err (!%p2531_p6)
}
  0x8e   : > { %2166 = dma.hbm_to_vmem [thread:$0]  (!%p2978_p9), %s477_s4, 16, %s480_s10, %s470_s7  }
  0x8f   : > { %499 = sbr.rel (%p2877_p12) target bundleno = 2764 (0xacc), region = 64  ;;  %s3007_s1 = sand.u32 (!%p2877_p12), 1, %s2677_s25  }
  0x90   : > { %s1873_s5 = sshll.u32 (!%p2877_p12), %s3007_s1, 4  ;;  %s502_s12 = scalar_lea.sflag (!%p2877_p12), [#allocation4], %s3007_s1 }
  0x91   : > { %s3011_s8 = scalar_lea.vmem (!%p2877_p12), [#allocation3], %s1873_s5 }
  0x94   : > { %2632 = dma.done.wait (%p2854_p3), %s502_s12, 256  }
  0x95   : > { %2634 = vsyncadd (%p2854_p3), %s502_s12, 4294967040  ;;  %s510_s0 = sand.u32 1, %s2843_s14   ;;  %s513_s26 = scalar_lea.vmem [#allocation6], %s3007_s1 }
  0x96   : > { %s511_s6 = scalar_lea.sflag [#allocation7], %s510_s0 }
  0x97   : > { %2636 = dma.done.wait (%p2854_p3), %s511_s6, 16  }
  0x98   : > { %2638 = vsyncadd (%p2854_p3), %s511_s6, 4294967280  ;;  %p3335_p12 = scmp.eq.s32.totalorder %s2843_s14, 0 }
  0x9a   : > { %2640 = dma.done.wait (%p3335_p12), [#allocation7], 3072   ;;  %p3336_p9 = pmov %p3335_p12 }
  0x9c   : > { %2642 = vsyncadd (%p3336_p9), [#allocation7], 4294964224  ;;  %p3337_p8 = pmov %p3336_p9 }
  0x9e   : > { %2644 = dma.done.wait (%p3337_p8), [#allocation10], 3072   ;;  %p3338_p2 = pmov %p3337_p8 }
  0xa0   : > { %2646 = vsyncadd (%p3338_p2), [#allocation10], 4294964224  ;;  %p3339_p10 = pmov %p3338_p2 }
  0xa1   : > { %p3340_p1 = pmov %p3338_p2 }
  0xa2   : > { %2648 = dma.done.wait (%p3339_p10), [#allocation13], 2048  }
  0xa3   : > { %2650 = vsyncadd (%p3340_p1), [#allocation13], 4294965248  ;;  %p594_p3 = scmp.lt.s32.totalorder %s2689_s28, 1  ;;  %v2715_v0 = vmov 0.0   ;;  %p596_p7 = scmp.lt.s32.totalorder %s2685_s27, 1  ;;  %vm2716_vm0 = vmmov 0   ;;  %v998_v53 = vlaneseq }
  0xa4   : > { %2049 = vmatprep.subr.bf16.mxu1 %v2715_v0  ;;  %2029 = vmatprep.subr.bf16.mxu0 %v2715_v0  ;;  %v2287_v1 = vld [vmem:[#allocation8 + $0xac] ss:$12 sps:$4 sm:$0xff]   ;;  %v2288_v2 = vld [vmem:[#allocation8 + $0x94] ss:$12 sps:$4 sm:$0xff]   ;;  %v2291_v4 = vld [vmem:[#allocation8 + $0x90] ss:$12 sps:$4 sm:$0xff]  }
  0xa5   : > { %2065 = vmatprep.mubr.msk.bf16.mxu1 %vm2716_vm0, %v2715_v0  ;;  %2045 = vmatprep.mubr.msk.bf16.mxu0 %vm2716_vm0, %v2715_v0  ;;  %s595_s14 = scalar_select %p594_p3, %s2689_s28, 1  ;;  %v2289_v3 = vld [vmem:[#allocation8 + $0xa8] ss:$12 sps:$4 sm:$0xff]   ;;  %v2293_v6 = vld [vmem:[#allocation8 + $0x78] ss:$12 sps:$4 sm:$0xff]   ;;  %v3108_v56 = vshrl.u32 %v998_v53, 7 }
  0xa6   : > { %s597_s16 = scalar_select %p596_p7, %s2685_s27, 1  ;;  %2050 = vmatpush3.bf16.msra.mxu1 %v2287_v1  ;;  %2030 = vmatpush3.bf16.msra.mxu0 %v2289_v3  ;;  %v2290_v5 = vld [vmem:[#allocation8 + $0x7c] ss:$12 sps:$4 sm:$0xff]   ;;  %v2292_v7 = vld [vmem:[#allocation8 + $0x64] ss:$12 sps:$4 sm:$0xff]   ;;  %vm1004_vm1 = vcmask 130048  }
  0xa7   : > { %s1879_s17 = sshll.u32 %s595_s14, 1  ;;  %2051 = vmatprep.subr.bf16.mxu1 %v2715_v0  ;;  %2031 = vmatprep.subr.bf16.mxu0 %v2715_v0  ;;  %v2295_v8 = vld [vmem:[#allocation8 + $0x60] ss:$12 sps:$4 sm:$0xff]   ;;  %v2297_v10 = vld [vmem:[#allocation8 + $0x48] ss:$12 sps:$4 sm:$0xff]   ;;  %s3341_s20 = sld [smem:[#allocation36_spill]] }
  0xa8   : > { %s3045_s19 = sadd.s32 %s1879_s17, %s597_s16  ;;  %v2294_v9 = vld [vmem:[#allocation8 + $0x4c] ss:$12 sps:$4 sm:$0xff]   ;;  %v2296_v11 = vld [vmem:[#allocation8 + $0x34] ss:$12 sps:$4 sm:$0xff]   ;;  %v2299_v12 = vld [vmem:[#allocation8 + $0x30] ss:$12 sps:$4 sm:$0xff]  }
  0xa9   : > { %s1880_s22 = sshll.u32 %s3045_s19, 3  ;;  %v2298_v13 = vld [vmem:[#allocation8 + $0x1c] ss:$12 sps:$4 sm:$0xff]   ;;  %v2301_v14 = vld [vmem:[#allocation8 + $0x18] ss:$12 sps:$4 sm:$0xff]   ;;  %s3342_s29 = sld [smem:[#allocation39_spill]] }
  0xaa   : > { %s3053_s24 = scalar_lea.vmem %s3259_s3, %s1880_s22  ;;  %2052 = vmatpush3.bf16.msra.mxu1 %v2288_v2  ;;  %2032 = vmatpush3.bf16.msra.mxu0 %v2291_v4  ;;  %v2300_v15 = vld [vmem:[#allocation8 + $0x4] ss:$12 sps:$4 sm:$0xff]   ;;  %v2302_v18 = vld [vmem:[#allocation8] ss:$12 sps:$4 sm:$0xff]   ;;  %v2306_v25 = vld [vmem:[#allocation8 + $0x68] ss:$12 sps:$4 sm:$0xff]  }
  0xab   : > { %2053 = vmatprep.subr.bf16.mxu1 %v2715_v0  ;;  %2033 = vmatprep.subr.bf16.mxu0 %v2715_v0  ;;  %v612_v16 = vld [vmem:[%s3011_s8] sm:$0xff]  ;;  %v613_v17 = vld [vmem:[%s3011_s8 + $0x8] sm:$0xff]  ;;  %v3111_v58 = vsub.s32 0, %v3108_v56  ;;  %s3344_s16 = sld [smem:[#allocation44_spill]]  ;;  %s3165_s14 = scalar_lea.vmem [#allocation15], %s3007_s1 }
  0xac   : > { %v615_v20 = vpack.c.bf16 %v613_v17, %v612_v16  ;;  %v2303_v21 = vld [vmem:[#allocation8 + $0xb0] ss:$12 sps:$4 sm:$0xff]   ;;  %v2304_v23 = vld [vmem:[#allocation8 + $0x98] ss:$12 sps:$4 sm:$0xff]   ;;  %v2305_v24 = vld [vmem:[#allocation8 + $0x80] ss:$12 sps:$4 sm:$0xff]  }
  0xad   : > { %s601_s4 = scalar_lea.vmem %s3341_s20, %s1880_s22  ;;  %v2307_v26 = vld [vmem:[#allocation8 + $0x50] ss:$12 sps:$4 sm:$0xff]   ;;  %v2308_v27 = vld [vmem:[#allocation8 + $0x38] ss:$12 sps:$4 sm:$0xff]   ;;  %v2309_v28 = vld [vmem:[#allocation8 + $0x20] ss:$12 sps:$4 sm:$0xff]  }
  0xae   : > { %2054 = vmatpush3.bf16.msra.mxu1 %v2290_v5  ;;  %2034 = vmatpush3.bf16.msra.mxu0 %v2293_v6  ;;  %v3074_v19 = vld [vmem:[%s601_s4] sm:$0xff]  ;;  %v2310_v29 = vld [vmem:[#allocation8 + $0x8] ss:$12 sps:$4 sm:$0xff]   ;;  %s3345_s15 = sld [smem:[#allocation42_spill]]  ;;  %p1958_p0 = scmp.ne.s32.totalorder %s2685_s27, 0 }
  0xaf   : > { %2055 = vmatprep.subr.bf16.mxu1 %v2715_v0  ;;  %2035 = vmatprep.subr.bf16.mxu0 %v2715_v0  ;;  %v614_v22 = vpack.c.bf16 %v3074_v19, %v3074_v19  ;;  %s3343_s5 = smov %s3342_s29  ;;  %v1892_v31 = vld [vmem:[%s3342_s29 + $0x1] ss:$0 sm:$0xff]  ;;  %v994_v54 = vld [vmem:[%s513_s26] sm:$0x1]  ;;  %v2314_v16 = vld [vmem:[#allocation9 + $0x20] sm:$0xff]   ;;  %s3346_s10 = sld [smem:[#allocation25_spill]] }
  0xb0   : > { %v1883_v38 = vld [vmem:[%s3343_s5] ss:$0 sm:$0xff]  ;;  %v1901_v45 = vld [vmem:[%s3343_s5 + $0x2] ss:$0 sm:$0xff]  ;;  %v1910_v55 = vadd.f32 -1.0, %v994_v54 }
  0xb1   : > { %v2315_v17 = vld [vmem:[#allocation9 + $0x18] sm:$0xff]  }
  0xb2   : > { %2056 = vmatpush3.bf16.msra.mxu1 %v2292_v7  ;;  %2036 = vmatpush3.bf16.msra.mxu0 %v2295_v8  ;;  %v996_v57 = vmul.f32 1e+09, %v1910_v55 }
  0xb3   : > { %2057 = vmatprep.subr.bf16.mxu1 %v2715_v0  ;;  %2037 = vmatprep.subr.bf16.mxu0 %v2715_v0 }
  0xb4   : > { %v1001_v59 = vrot.slane %v996_v57, %v3111_v58 }
  0xb5   : > { %s585_s7 = sand.u32 1, %s3346_s10  }
  0xb6   : > { %2058 = vmatpush3.bf16.msra.mxu1 %v2294_v9  ;;  %2038 = vmatpush3.bf16.msra.mxu0 %v2297_v10  ;;  %s3156_s8 = sshll.u32 %s585_s7, 3 }
  0xb7   : > { %2059 = vmatprep.subr.bf16.mxu1 %v2715_v0  ;;  %2039 = vmatprep.subr.bf16.mxu0 %v2715_v0  ;;  %s587_s26 = scalar_lea.vmem [#allocation14], %s3156_s8 }
  0xba   : > { %2060 = vmatpush3.bf16.msra.mxu1 %v2296_v11  ;;  %2040 = vmatpush3.bf16.msra.mxu0 %v2299_v12  ;;  %v2311_v12 = vld [vmem:[#allocation9 + $0x38] sm:$0xff]  }
  0xbb   : > { %2061 = vmatprep.subr.bf16.mxu1 %v2715_v0  ;;  %2041 = vmatprep.subr.bf16.mxu0 %v2715_v0 }
  0xbe   : > { %2062 = vmatpush3.bf16.msra.mxu1 %v2298_v13  ;;  %2042 = vmatpush3.bf16.msra.mxu0 %v2301_v14  ;;  %v2312_v14 = vld [vmem:[#allocation9 + $0x30] sm:$0xff]  }
  0xbf   : > { %2063 = vmatprep.subr.bf16.mxu1 %v2715_v0  ;;  %2043 = vmatprep.subr.bf16.mxu0 %v2715_v0 }
  0xc2   : > { %2064 = vmatpush3.bf16.msra.mxu1 %v2300_v15  ;;  %2044 = vmatpush3.bf16.msra.mxu0 %v2302_v18  ;;  %v2313_v15 = vld [vmem:[#allocation9 + $0x28] sm:$0xff]   ;;  %v2316_v18 = vld [vmem:[#allocation9 + $0x10] sm:$0xff]  }
  0xc3   : > { %2095 = vmatprep.subr.bf16.mxu1 %v2715_v0  ;;  %2069 = vmatprep.subr.bf16.mxu0 %v2715_v0 }
  0xc5   : > { %2066 = vmatmul.mubr.bf16.vlgmr.msra.gmra.mxu1 %v615_v20  ;;  %2046 = vmatmul.mubr.bf16.vlgmr.msra.gmra.mxu0 %v614_v22 }
  0xc6   : > { %2097 = vmatprep.mubr.msk.bf16.mxu1 %vm2716_vm0, %v2715_v0  ;;  %2070 = vmatpush3.bf16.msra.mxu0 %v2303_v21  ;;  %v2318_v21 = vld [vmem:[#allocation9] sm:$0xff]  }
  0xc7   : > { %2085 = vmatprep.mubr.msk.bf16.mxu0 %vm2716_vm0, %v2715_v0  ;;  %2071 = vmatprep.subr.bf16.mxu0 %v2715_v0 }
  0xca   : > { %2072 = vmatpush3.bf16.msra.mxu0 %v2304_v23 }
  0xcb   : > { %2073 = vmatprep.subr.bf16.mxu0 %v2715_v0 }
  0xce   : > { %2074 = vmatpush3.bf16.msra.mxu0 %v2305_v24 }
  0xcf   : > { %2075 = vmatprep.subr.bf16.mxu0 %v2715_v0 }
  0xd2   : > { %2076 = vmatpush3.bf16.msra.mxu0 %v2306_v25 }
  0xd3   : > { %2077 = vmatprep.subr.bf16.mxu0 %v2715_v0 }
  0xd6   : > { %2078 = vmatpush3.bf16.msra.mxu0 %v2307_v26 }
  0xd7   : > { %2079 = vmatprep.subr.bf16.mxu0 %v2715_v0 }
  0xda   : > { %2080 = vmatpush3.bf16.msra.mxu0 %v2308_v27  ;;  %v1912_v27 = vld [vmem:[%s3344_s16] ss:$0 sm:$0xff] }
  0xdb   : > { %2081 = vmatprep.subr.bf16.mxu0 %v2715_v0 }
  0xde   : > { %2082 = vmatpush3.bf16.msra.mxu0 %v2309_v28 }
  0xdf   : > { %2083 = vmatprep.subr.bf16.mxu0 %v2715_v0 }
  0xe2   : > { %2084 = vmatpush3.bf16.msra.mxu0 %v2310_v29 }
  0xe3   : > { %2089 = vmatprep.subr.bf16.mxu0 %v2715_v0 }
  0xe5   : > { %2086 = vmatmul.mubr.bf16.vlgmr.msra.gmra.mxu0 %v615_v20  ;;  %v2317_v20 = vld [vmem:[#allocation9 + $0x8] sm:$0xff]  }
  0xe6   : > { %2091 = vmatprep.mubr.msk.bf16.mxu0 %vm2716_vm0, %v2715_v0 }
 0x185   : > { %v832_v30 = vpop.f32.mrf.mxu1  ;;  %v721_v33 = vpop.f32.mrf.mxu0 }
 0x186   : > { %v833_v36 = vadd.f32 %v1892_v31, %v832_v30  ;;  %v722_v42 = vadd.f32 %v1883_v38, %v721_v33  ;;  %v2319_v33 = vld [vmem:[#allocation11 + $0x70] ss:$8 sps:$4 sm:$0xff]  }
 0x187   : > { %v2067_v32 = vpop.f32.mrf.mxu1  ;;  %v2047_v35 = vpop.f32.mrf.mxu0 }
 0x188   : > { %v951_v44 = vpack.c.bf16 %v722_v42, %v722_v42  ;;  %v2324_v35 = vld [vmem:[#allocation11 + $0x64] ss:$8 sps:$4 sm:$0xff]   ;;  %v2325_v42 = vld [vmem:[#allocation11 + $0x50] ss:$8 sps:$4 sm:$0xff]  }
 0x189   : > { %v835_v34 = vpop.f32.mrf.mxu1  ;;  %v724_v40 = vpop.f32.mrf.mxu0 }
 0x18a   : > { %v836_v37 = vadd.f32 %v1892_v31, %v835_v34  ;;  %v2321_v34 = vld [vmem:[#allocation11 + $0x74] ss:$8 sps:$4 sm:$0xff]  }
 0x18b   : > { %v2068_v39 = vpop.f32.mrf.mxu1  ;;  %v2048_v43 = vpop.f32.mrf.mxu0 }
 0x18c   : > { %v952_v41 = vpack.c.bf16 %v836_v37, %v833_v36  ;;  %v2322_v36 = vld [vmem:[#allocation11 + $0x60] ss:$8 sps:$4 sm:$0xff]   ;;  %v2330_v43 = vld [vmem:[#allocation11 + $0x44] ss:$8 sps:$4 sm:$0xff]  }
 0x18e   : > { %2090 = vmatpush3.bf16.xpose.msra.mxu0 %v952_v41  ;;  %v2327_v41 = vld [vmem:[#allocation11 + $0x54] ss:$8 sps:$4 sm:$0xff]  }
 0x18f   : > { %1305 = vmatprep.subr.bf16.mxu0 %v2321_v34 }
 0x195   : > { %2092 = vmatmul.mubr.bf16.vlgmr.msra.gmra.mxu0 %v951_v44  ;;  %v2333_v44 = vld [vmem:[#allocation11 + $0x34] ss:$8 sps:$4 sm:$0xff]  }
 0x196   : > { %1306 = vmatpush1.bf16.msra.mxu0 %v2319_v33 }
 0x197   : > { %1307 = vmatprep.subr.bf16.mxu0 %v2324_v35 }
 0x19a   : > { %1308 = vmatpush1.bf16.msra.mxu0 %v2322_v36 }
 0x19b   : > { %1309 = vmatprep.subr.bf16.mxu0 %v2327_v41 }
 0x19e   : > { %1310 = vmatpush1.bf16.msra.mxu0 %v2325_v42 }
 0x19f   : > { %1311 = vmatprep.subr.bf16.mxu0 %v2330_v43 }
 0x1a5   : > { %v944_v46 = vpop.f32.mrf.mxu0 }
 0x1a6   : > { %v945_v48 = vadd.f32 %v1901_v45, %v944_v46  ;;  %v2336_v46 = vld [vmem:[#allocation11 + $0x24] ss:$8 sps:$4 sm:$0xff]  }
 0x1a7   : > { %v2087_v47 = vpop.f32.mrf.mxu0 }
 0x1a8   : > { %v2717_v47 = vmov 0  }
 0x1a9   : > { %v947_v49 = vpop.f32.mrf.mxu0  ;;  %1337 = vmatprep.mubr.bf16.mxu0 %v2717_v47 }
 0x1aa   : > { %v948_v50 = vadd.f32 %v1901_v45, %v947_v49  ;;  %v2331_v45 = vld [vmem:[#allocation11 + $0x30] ss:$8 sps:$4 sm:$0xff]   ;;  %v2339_v49 = vld [vmem:[#allocation11 + $0x14] ss:$8 sps:$4 sm:$0xff]  }
 0x1ab   : > { %v2088_v51 = vpop.f32.mrf.mxu0 }
 0x1ac   : > { %v1017_v52 = vpack.c.bf16 %v948_v50, %v945_v48  ;;  %v2334_v48 = vld [vmem:[#allocation11 + $0x20] ss:$8 sps:$4 sm:$0xff]   ;;  %v2337_v50 = vld [vmem:[#allocation11 + $0x10] ss:$8 sps:$4 sm:$0xff]   ;;  %v2342_v51 = vld [vmem:[#allocation11 + $0x4] ss:$8 sps:$4 sm:$0xff]  }
 0x1ae   : > { %2096 = vmatpush3.bf16.msra.mxu1 %v1017_v52  ;;  %v2340_v52 = vld [vmem:[#allocation11] ss:$8 sps:$4 sm:$0xff]  }
 0x1af   : > { %2101 = vmatprep.subr.bf16.mxu1 %v2715_v0 }
 0x255   : > { %v987_v60 = vpop.f32.mrf.mxu0 }
 0x256   : > { %v993_v61 = vmul.f32 0.088388346, %v987_v60 }
 0x257   : > { %v2093_v62 = vpop.f32.mrf.mxu0 }
 0x258   : > { %v1003_v63 = vadd.f32 %v1001_v59, %v993_v61  ;;  %v1921_v59 = vld [vmem:[%s3344_s16 + $0x1] ss:$0 sm:$0xff]  ;;  %v1922_v61 = vld [vmem:[%s3344_s16 + $0x2] ss:$0 sm:$0xff] }
 0x259   : > { %v990_v1 = vpop.f32.mrf.mxu0 }
 0x25a   : > { %v1005_v2 = vsel %vm1004_vm1, %v1003_v63, -inf }
 0x25b   : > { %1006 = vmax.xlane.f32.xlu0 %v1005_v2  ;;  %v2094_v3 = vpop.f32.mrf.mxu0  ;;  %v2343_v2 = vld [vmem:[#allocation12 + $0x78] sm:$0xff]  }
 0x25c   : > { %v2344_v3 = vld [vmem:[#allocation12 + $0x38] sm:$0xff]  }
 0x2e4   : > { %v1007_v4 = vpop.xlane.xlu0 %1006 }
 0x2e5   : > { %v1008_v5 = vsub.f32 %v1003_v63, %v1007_v4  ;;  %v2345_v4 = vld [vmem:[#allocation12 + $0x70] sm:$0xff]  }
 0x2e7   : > { %v1009_v6 = vmul.f32 1.442695, %v1008_v5  ;;  %v2346_v5 = vld [vmem:[#allocation12 + $0x30] sm:$0xff]  }
 0x2e9   : > { %2359 = vpow2.f32 %v1009_v6  ;;  %v2347_v6 = vld [vmem:[#allocation12 + $0x68] sm:$0xff]  }
 0x2f6   : > { %v2360_v7 = vpop.eup %2359 }
 0x2f7   : > { %v1011_v8 = vsel %vm1004_vm1, %v2360_v7, 0.0 }
 0x2f8   : > { %1012 = vadd.xlane.f32.xlu0 %v1011_v8  ;;  %v2349_v8 = vld [vmem:[#allocation12 + $0x60] sm:$0xff]  }
 0x381   : > { %v1013_v9 = vpop.xlane.xlu0 %1012 }
 0x382   : > { %2361 = vrcp.f32 %v1013_v9  ;;  %v2350_v9 = vld [vmem:[#allocation12 + $0x20] sm:$0xff]  }
 0x38f   : > { %v2362_v10 = vpop.eup %2361 }
 0x390   : > { %v1015_v11 = vmul.f32 %v2362_v10, %v2360_v7  ;;  %v2348_v7 = vld [vmem:[#allocation12 + $0x28] sm:$0xff]   ;;  %v2351_v10 = vld [vmem:[#allocation12 + $0x58] sm:$0xff]  }
 0x392   : > { %v1016_v13 = vpack.c.bf16 %v1015_v11, %v1015_v11  ;;  %v2352_v11 = vld [vmem:[#allocation12 + $0x18] sm:$0xff]  }
 0x394   : > { %2098 = vmatmul.mubr.msk.bf16.vlgmr.msra.gmra.mxu1 %vm1004_vm1, %v1016_v13  ;;  %v2354_v13 = vld [vmem:[#allocation12 + $0x10] sm:$0xff]  }
 0x395   : > { %2102 = vmatpush3.bf16.msra.mxu1 %v2311_v12  ;;  %2117 = vmatprep.mubr.msk.bf16.mxu1 %vm2716_vm0, %v2715_v0  ;;  %v2353_v12 = vld [vmem:[#allocation12 + $0x50] sm:$0xff]  }
 0x396   : > { %2103 = vmatprep.subr.bf16.mxu1 %v2715_v0 }
 0x399   : > { %2104 = vmatpush3.bf16.msra.mxu1 %v2312_v14  ;;  %v2355_v14 = vld [vmem:[#allocation12 + $0x48] sm:$0xff]  }
 0x39a   : > { %2105 = vmatprep.subr.bf16.mxu1 %v2715_v0 }
 0x39d   : > { %2106 = vmatpush3.bf16.msra.mxu1 %v2313_v15  ;;  %v2356_v15 = vld [vmem:[#allocation12 + $0x8] sm:$0xff]  }
 0x39e   : > { %2107 = vmatprep.subr.bf16.mxu1 %v2715_v0 }
 0x3a1   : > { %2108 = vmatpush3.bf16.msra.mxu1 %v2314_v16  ;;  %v2357_v16 = vld [vmem:[#allocation12 + $0x40] sm:$0xff]  }
 0x3a2   : > { %2109 = vmatprep.subr.bf16.mxu1 %v2715_v0 }
 0x3a5   : > { %2110 = vmatpush3.bf16.msra.mxu1 %v2315_v17  ;;  %v2358_v17 = vld [vmem:[#allocation12] sm:$0xff]  }
 0x3a6   : > { %2111 = vmatprep.subr.bf16.mxu1 %v2715_v0 }
 0x3a9   : > { %2112 = vmatpush3.bf16.msra.mxu1 %v2316_v18  ;;  %v1213_v18 = vld [vmem:[%s3345_s15] sm:$0x3] }
 0x3aa   : > { %2113 = vmatprep.subr.bf16.mxu1 %v2715_v0 }
 0x3ad   : > { %2114 = vmatpush3.bf16.msra.mxu1 %v2317_v20  ;;  %v1221_v20 = vsub.s32 1, %v3108_v56 }
 0x3ae   : > { %2115 = vmatprep.subr.bf16.mxu1 %v2715_v0 }
 0x3b1   : > { %2116 = vmatpush3.bf16.msra.mxu1 %v2318_v21  ;;  %v1218_v21 = vrot.slane %v1213_v18, %v3111_v58 }
 0x3b2   : > { %2007 = vmatprep.subr.bf16.mxu1 %v2343_v2 }
 0x454   : > { %v1055_v22 = vpop.f32.mrf.mxu1 }
 0x455   : > { %v1061_v23 = vpack.c.bf16 %v1055_v22, %v1055_v22  ;;  %v1222_v22 = vrot.slane %v1213_v18, %v1221_v20 }
 0x456   : > { %v2099_v24 = vpop.f32.mrf.mxu1 }
 0x457   : > { %2118 = vmatmul.mubr.bf16.vlgmr.msra.gmra.mxu1 %v1061_v23 }
 0x458   : > { %v1058_v25 = vpop.f32.mrf.mxu1  ;;  %2008 = vmatpush3.bf16.msra.mxu1 %v2344_v3  ;;  %v1956_v3 = vld [vmem:[%s3344_s16 + $0x4] ss:$0 sm:$0xff] }
 0x459   : > { %2009 = vmatprep.subr.bf16.mxu1 %v2345_v4  ;;  %v1957_v4 = vld [vmem:[%s3344_s16 + $0x5] ss:$0 sm:$0xff] }
 0x45a   : > { %v2100_v26 = vpop.f32.mrf.mxu1 }
 0x45c   : > { %2010 = vmatpush3.bf16.msra.mxu1 %v2346_v5 }
 0x45d   : > { %2011 = vmatprep.subr.bf16.mxu1 %v2347_v6 }
 0x460   : > { %2012 = vmatpush3.bf16.msra.mxu1 %v2348_v7 }
 0x461   : > { %2013 = vmatprep.subr.bf16.mxu1 %v2349_v8 }
 0x464   : > { %2014 = vmatpush3.bf16.msra.mxu1 %v2350_v9 }
 0x465   : > { %2015 = vmatprep.subr.bf16.mxu1 %v2351_v10 }
 0x468   : > { %2016 = vmatpush3.bf16.msra.mxu1 %v2352_v11 }
 0x469   : > { %2017 = vmatprep.subr.bf16.mxu1 %v2353_v12 }
 0x46c   : > { %2018 = vmatpush3.bf16.msra.mxu1 %v2354_v13 }
 0x46d   : > { %2019 = vmatprep.subr.bf16.mxu1 %v2355_v14 }
 0x470   : > { %2020 = vmatpush3.bf16.msra.mxu1 %v2356_v15 }
 0x471   : > { %2021 = vmatprep.subr.bf16.mxu1 %v2357_v16 }
 0x474   : > { %2022 = vmatpush3.bf16.msra.mxu1 %v2358_v17 }
 0x517   : > { %v1165_v28 = vpop.f32.mrf.mxu1 }
 0x518   : > { %v1166_v29 = vadd.f32 %v1912_v27, %v1165_v28 }
 0x519   : > { %v2119_v30 = vpop.f32.mrf.mxu1 }
 0x51a   : > { %v1171_v31 = vadd.f32 %v1166_v29, %v3074_v19  ;;  %v2328_v19 = vld [vmem:[#allocation11 + $0x40] ss:$8 sps:$4 sm:$0xff]  }
 0x51b   : > { %v1168_v32 = vpop.f32.mrf.mxu1  ;;  %1312 = vmatpush1.bf16.msra.mxu0 %v2328_v19 }
 0x51c   : > { %1172 = vadd.xlane.f32.xlu1 %v1171_v31  ;;  %1313 = vmatprep.subr.bf16.mxu0 %v2333_v44 }
 0x51d   : > { %v2120_v0 = vpop.f32.mrf.mxu1 }
 0x51f   : > { %1314 = vmatpush1.bf16.msra.mxu0 %v2331_v45 }
 0x520   : > { %1315 = vmatprep.subr.bf16.mxu0 %v2336_v46 }
 0x523   : > { %1316 = vmatpush1.bf16.msra.mxu0 %v2334_v48  ;;  %v1939_v48 = vld [vmem:[%s3344_s16 + $0x3] ss:$0 sm:$0xff] }
 0x524   : > { %1317 = vmatprep.subr.bf16.mxu0 %v2339_v49 }
 0x527   : > { %1318 = vmatpush1.bf16.msra.mxu0 %v2337_v50 }
 0x528   : > { %1319 = vmatprep.subr.bf16.mxu0 %v2342_v51 }
 0x52b   : > { %1320 = vmatpush1.bf16.msra.mxu0 %v2340_v52 }
 0x5a5   : > { %v1173_v37 = vpop.xlane.xlu1 %1172 }
 0x5a6   : > { %v1175_v38 = vmul.f32 0.0078125, %v1173_v37 }
 0x5a8   : > { %v1176_v39 = vsub.f32 %v1171_v31, %v1175_v38 }
 0x5aa   : > { %v1177_v40 = vmul.f32 %v1176_v39, %v1176_v39 }
 0x5ac   : > { %1178 = vadd.xlane.f32.xlu1 %v1177_v40 }
 0x635   : > { %v1179_v53 = vpop.xlane.xlu1 %1178 }
 0x636   : > { %v1180_v54 = vmul.f32 0.0078125, %v1179_v53 }
 0x638   : > { %v1181_v55 = vadd.f32 1e-05, %v1180_v54 }
 0x63a   : > { %2363 = vrsqrt.f32 %v1181_v55 }
 0x647   : > { %v2364_v57 = vpop.eup %2363 }
 0x648   : > { %v1183_v60 = vmul.f32 %v2364_v57, %v1176_v39 }
 0x64a   : > { %v1189_v62 = vmul.f32 %v1921_v59, %v1183_v60 }
 0x64c   : > { %v3137_v63 = vadd.f32 %v1922_v61, %v1189_v62 }
 0x64e   : > { %v1196_v1 = vpack.c.bf16 %v3137_v63, %v3137_v63 }
 0x650   : > { %1338 = vmatmul.mubr.bf16.vlgmr.msra.gmra.mxu0 %v1196_v1 }
 0x710   : > { %v1339_v23 = vpop.f32.mrf.mxu0 }
 0x711   : > { %v1340_v24 = vadd.f32 %v1339_v23, %v1218_v21 }
 0x712   : > { %v1341_v25 = vpop.f32.mrf.mxu0 }
 0x713   : > { %v1346_v26 = vmul.f32 %v1340_v24, %v1340_v24  ;;  %v1342_v27 = vadd.f32 %v1341_v25, %v1222_v22 }
 0x714   : > { %v1343_v28 = vpop.f32.mrf.mxu0 }
 0x715   : > { %v1348_v29 = vmul.f32 %v1346_v26, %v1340_v24  ;;  %v1347_v30 = vmul.f32 %v1342_v27, %v1342_v27 }
 0x716   : > { %v1344_v31 = vpop.f32.mrf.mxu0 }
 0x717   : > { %v1350_v32 = vmul.f32 0.044715, %v1348_v29  ;;  %v1349_v0 = vmul.f32 %v1347_v30, %v1342_v27 }
 0x719   : > { %v1352_v33 = vadd.f32 %v1350_v32, %v1340_v24  ;;  %v1351_v34 = vmul.f32 0.044715, %v1349_v0 }
 0x71b   : > { %v1354_v35 = vmul.f32 0.7978846, %v1352_v33  ;;  %v1353_v36 = vadd.f32 %v1351_v34, %v1342_v27 }
 0x71d   : > { %2365 = vtanh.f32 %v1354_v35  ;;  %v1355_v56 = vmul.f32 0.7978846, %v1353_v36 }
 0x71f   : > { %2367 = vtanh.f32 %v1355_v56 }
 0x72a   : > { %v2366_v37 = vpop.eup %2365 }
 0x72b   : > { %v1358_v38 = vadd.f32 1.0, %v2366_v37 }
 0x72c   : > { %v2368_v39 = vpop.eup %2367 }
 0x72d   : > { %v1359_v40 = vadd.f32 1.0, %v2368_v39  ;;  %v1360_v41 = vmul.f32 0.5, %v1358_v38 }
 0x72f   : > { %v1361_v42 = vmul.f32 0.5, %v1359_v40  ;;  %v1362_v19 = vmul.f32 %v1360_v41, %v1340_v24 }
 0x731   : > { %v1363_v43 = vmul.f32 %v1361_v42, %v1342_v27  ;;  %v1364_v45 = vpack.c.bf16 %v1362_v19, %v1362_v19 }
 0x733   : > { %v1365_v44 = vpack.c.bf16 %v1363_v43, %v1363_v43 }
 0x735   : > { %1531 = vmatprep.mubr.bf16.mxu1 %v1365_v44 }
 0x736   : > { %1532 = vmatmul.mubr.bf16.vlgmr.msra.gmra.mxu1 %v1364_v45 }
 0x7f6   : > { %v2023_v46 = vpop.f32.mrf.mxu1 }
 0x7f8   : > { %v2024_v49 = vpop.f32.mrf.mxu1 }
 0x7f9   : > { %v2025_v50 = vadd.f32 %v2024_v49, %v2023_v46 }
 0x7fa   : > { %v2026_v51 = vpop.f32.mrf.mxu1 }
 0x7fb   : > { %v1534_v52 = vadd.f32 %v2025_v50, %v1939_v48 }
 0x7fc   : > { %v2027_v53 = vpop.f32.mrf.mxu1 }
 0x7fd   : > { %v1539_v54 = vadd.f32 %v1534_v52, %v3137_v63 }
 0x7ff   : > { %1540 = vadd.xlane.f32.xlu0 %v1539_v54 }
 0x888   : > { %v1541_v55 = vpop.xlane.xlu0 %1540 }
 0x889   : > { %v1542_v57 = vmul.f32 0.0078125, %v1541_v55 }
 0x88b   : > { %v1543_v59 = vsub.f32 %v1539_v54, %v1542_v57 }
 0x88d   : > { %v1544_v60 = vmul.f32 %v1543_v59, %v1543_v59 }
 0x88f   : > { %1545 = vadd.xlane.f32.xlu1 %v1544_v60 }
 0x918   : > { %v1546_v61 = vpop.xlane.xlu1 %1545 }
 0x919   : > { %v1547_v62 = vmul.f32 0.0078125, %v1546_v61 }
 0x91b   : > { %v1548_v1 = vadd.f32 1e-05, %v1547_v62 }
 0x91d   : > { %2369 = vrsqrt.f32 %v1548_v1 }
 0x92a   : > { %v2370_v2 = vpop.eup %2369 }
 0x92b   : > { %v1550_v63 = vmul.f32 %v2370_v2, %v1543_v59 }
 0x92d   : > { %v1556_v5 = vmul.f32 %v1956_v3, %v1550_v63  ;;  %1567 = sbr.rel (%p1958_p0) target bundleno = 2356 (0x934), region = 92 }
 0x92f   : > { %v1562_v6 = vadd.f32 %v1957_v4, %v1556_v5 }
 0x931   : > { %1563 = vst [vmem:[%s587_s26] sm:$0xff] %v1562_v6 }
 0x932   : > { %vm1569_vm2 = vcmask 0   ;;  %v2718_v7 = vmov 0.0  }
 0x933   : > { %1568 = vst [vmem:[%s3165_s14] sm:$0x1] %v2718_v7  ;;  %1570 = vst.msk [vmem:[#allocation2] sm:$0x1] %vm1569_vm2, %v2718_v7 }
 0x934 PF: > { %v1571_v8 = vld [vmem:[%s3053_s24] sm:$0xff]  ;;  %vm1588_vm3 = vcmask 7168   ;;  %2371 = vset.pattern.permute.xlu0 %v2717_v47  ;;  %vm1601_vm4 = vcmask 0   ;;  %p1959_p11 = scmp.ne.s32.totalorder %s2685_s27, 1 }
 0x935   : > { %v1589_v9 = vsel %vm1588_vm3, %v1571_v8, 0.0 }
 0x936   : > { %1590 = vadd.xlane.f32.xlu0 %v1589_v9 }
 0x93a   : > { %v1572_v24 = vld [vmem:[%s3165_s14] sm:$0x1] }
 0x93b   : > { %v1587_v27 = vld [vmem:[#allocation2] sm:$0x1] }
 0x94c   : > { %1575 = vperm.xlu0 %2371, %v1571_v8  }
 0x9bf   : > { %v1591_v10 = vpop.xlane.xlu0 %1590 }
 0x9c0   : > { %v1592_v11 = vrot.slane %v1591_v10, 4 }
 0x9c2   : > { %v1593_v12 = vadd.f32 %v1592_v11, %v1591_v10 }
 0x9c4   : > { %v1594_v13 = vrot.slane %v1593_v12, 2 }
 0x9c6   : > { %v1595_v14 = vadd.f32 %v1594_v13, %v1593_v12 }
 0x9c7   : > { %v1576_v15 = vpop.permute.xlu0 %1575 }
 0x9c8   : > { %v1596_v16 = vrot.slane %v1595_v14, 1  ;;  %v1578_v17 = vmul.f32 %v1576_v15, %v1562_v6 }
 0x9ca   : > { %v1597_v18 = vadd.f32 %v1596_v16, %v1595_v14  ;;  %v1579_v20 = vrot.slane %v1578_v17, 4 }
 0x9cc   : > { %2121 = vpush %v1597_v18  ;;  %v1580_v21 = vadd.f32 %v1579_v20, %v1578_v17 }
 0x9ce   : > { %v1581_v22 = vrot.slane %v1580_v21, 2 }
 0x9d0   : > { %v1582_v23 = vadd.f32 %v1581_v22, %v1580_v21 }
 0x9d2   : > { %v1583_v47 = vrot.slane %v1582_v23, 1 }
 0x9d4   : > { %v1584_v25 = vadd.f32 %v1583_v47, %v1582_v23 }
 0x9d6   : > { %v1585_v26 = vadd.f32 %v1584_v25, %v1572_v24 }
 0x9d8   : > { %1586 = vst [vmem:[%s3165_s14] sm:$0x1] %v1585_v26 }
 0x9fd   : > { %s2122_s24 = spop %2121  ;;  %1606 = sbr.rel (%p1959_p11) target bundleno = 2714 (0xa9a), region = 96 }
 0x9fe   : > { %v1599_v28 = vstv %s2122_s24 }
 0x9ff   : > { %v1600_v29 = vadd.f32 %v1599_v28, %v1587_v27 }
 0xa01   : > { %1602 = vst.msk [vmem:[#allocation2] sm:$0x1] %vm1601_vm4, %v1600_v29 }
 0xa02   : > { %v2719_v31 = vmov 0   ;;  %v1607_v34 = vld [vmem:[%s3165_s14] sm:$0x1] }
 0xa03   : > { %2372 = vset.pattern.permute.xlu0 %v2719_v31 }
 0xa08   : > { %v1608_v30 = vld [vmem:[#allocation2] sm:$0x1] }
 0xa09   : > { %v1609_v32 = vmax.f32 %v1608_v30, 1.0 }
 0xa0b   : > { %1612 = vperm.xlu0 %2372, %v1609_v32  }
 0xa86   : > { %v1613_v0 = vpop.permute.xlu0 %1612 }
 0xa87   : > { %v1618_v33 = vrot.slane %v1613_v0, %v3111_v58 }
 0xa89   : > { %2373 = vrcp.f32 %v1618_v33 }
 0xa96   : > { %v2374_v35 = vpop.eup %2373 }
 0xa97   : > { %v1620_v36 = vmul.f32 %v2374_v35, %v1607_v34 }
 0xa99   : > { %1621 = vst [vmem:[%s3165_s14] sm:$0x1] %v1620_v36 }
 0xa9a PF: > { %s3348_s19 = sld [smem:[#allocation29_spill]]  ;;  %s1961_s22 = sshll.u32 %s2689_s28, 1 }
 0xa9b   : > { %s1638_s11 = sadd.s32 %s2685_s27, %s1961_s22  ;;  %s1642_s21 = sshll.u32 %s587_s26, 4  ;;  %s1643_s21 = int_to_ptr.vmem [resolvable:$true] %s1642_s21 }
 0xa9c   : > { %s1962_s18 = sshll.u32 %s1638_s11, 7  ;;  %s3349_s4 = sld [smem:[#allocation45_spill]] }
 0xa9d   : > { %s1623_s29 = scalar_lea.sflag [#allocation5], %s585_s7  ;;  %s2535_s12 = scalar_lea.vmem %s1643_s21, 128 }
 0xa9e   : > { %p2536_p13 = scmp.ne.s32.totalorder %s1643_s21, %s2535_s12  ;;  %s2720_s0 = smov [#allocation14]  }
 0xa9f   : > { %s2539_s6 = sshll.u32 %s2720_s0, 4  ;;  %s2540_s6 = int_to_ptr.vmem [resolvable:$false] %s2539_s6 }
 0xaa0   : > { %p3350_p5 = scmp.ne.s32.totalorder %s3348_s19, 0  ;;  %s2541_s24 = scalar_lea.vmem %s2540_s6, 256 }
 0xaa1   : > { %p2542_p9 = scmp.lt.s32.totalorder %s1643_s21, %s2540_s6  ;;  %p2543_p8 = scmp.lt.s32.totalorder %s2541_s24, %s2535_s12 }
 0xaa2   : > { %s1640_s10 = scalar_lea.hbm %s3349_s4, %s1962_s18  ;;  %p2537_p6 = pnand %p2536_p13, %p3350_p5 }
 0xaa3   : > { %p2544_p2 = por %p2543_p8, %p2542_p9 }
 0xaa4   : > { %p2538_p12 = pneg %p2537_p6 }
 0xaa6   : > { %p2545_p10 = pnand %p2544_p2, %p2538_p12 }
 0xaa8   : > { %2548 = shalt.err (!%p2545_p10)
}
 0xaa9   : > { %s2549_s27 = scalar_lea.hbm %s1640_s10, 128  ;;  %s2553_s26 = scalar_lea.hbm %s3349_s4, 512 }
 0xaaa   : > { %p2550_p1 = scmp.ne.s32.totalorder %s1640_s10, %s2549_s27  ;;  %p2554_p0 = scmp.lt.s32.totalorder %s1640_s10, %s3349_s4 }
 0xaab   : > { %p2555_p11 = scmp.lt.s32.totalorder %s2553_s26, %s2549_s27 }
 0xaac   : > { %p2551_p3 = pnand %p2550_p1, %p3350_p5 }
 0xaad   : > { %p2556_p13 = por %p2555_p11, %p2554_p0 }
 0xaae   : > { %p2552_p7 = pneg %p2551_p3 }
 0xab0   : > { %p2557_p6 = pnand %p2556_p13, %p2552_p7 }
 0xab2   : > { %2560 = shalt.err (!%p2557_p6)
}
 0xab3   : > { %2143 = dma.vmem_to_hbm [thread:$0]  (%p3350_p5), %s1643_s21, 128, %s1640_s10, %s1623_s29  }
 0xab4   : > { %s1963_s18 = sshll.u32 %s2689_s28, 4  ;;  %s1655_s15 = sshll.u32 %s3165_s14, 4  ;;  %s1656_s15 = int_to_ptr.vmem [resolvable:$true] %s1655_s15 }
 0xab5   : > { %s3352_s0 = sld [smem:[#allocation46_spill]]  ;;  %s1628_s24 = scalar_lea.sflag [#allocation16], %s3007_s1 }
 0xab6   : > { %s2561_s7 = scalar_lea.vmem %s1656_s15, 16  ;;  %s2721_s27 = smov [#allocation15]  }
 0xab7   : > { %p2562_p12 = scmp.ne.s32.totalorder %s1656_s15, %s2561_s7  ;;  %s2565_s19 = sshll.u32 %s2721_s27, 4  ;;  %s2566_s19 = int_to_ptr.vmem [resolvable:$false] %s2565_s19 }
 0xab8   : > { %s2567_s8 = scalar_lea.vmem %s2566_s19, 32  ;;  %p2568_p2 = scmp.lt.s32.totalorder %s1656_s15, %s2566_s19 }
 0xab9   : > { %p2563_p9 = pnand %p2562_p12, %p2945_p4  ;;  %p2569_p10 = scmp.lt.s32.totalorder %s2567_s8, %s2561_s7 }
 0xabb   : > { %s1653_s6 = scalar_lea.hbm %s3352_s0, %s1963_s18  ;;  %p2564_p8 = pneg %p2563_p9 }
 0xabc   : > { %p2570_p5 = por %p2569_p10, %p2568_p2 }
 0xabe   : > { %p2571_p1 = pnand %p2570_p5, %p2564_p8 }
 0xac0   : > { %2574 = shalt.err (!%p2571_p1)
}
 0xac1   : > { %s2575_s28 = scalar_lea.hbm %s1653_s6, 16  ;;  %s2579_s21 = scalar_lea.hbm %s3352_s0, 32 }
 0xac2   : > { %p2576_p3 = scmp.ne.s32.totalorder %s1653_s6, %s2575_s28  ;;  %p2580_p11 = scmp.lt.s32.totalorder %s1653_s6, %s3352_s0 }
 0xac3   : > { %p2581_p13 = scmp.lt.s32.totalorder %s2579_s21, %s2575_s28 }
 0xac4   : > { %p2577_p7 = pnand %p2576_p3, %p2945_p4 }
 0xac5   : > { %p2582_p6 = por %p2581_p13, %p2580_p11 }
 0xac6   : > { %p2578_p0 = pneg %p2577_p7 }
 0xac8   : > { %p2583_p12 = pnand %p2582_p6, %p2578_p0 }
 0xaca   : > { %2586 = shalt.err (!%p2583_p12)
}
 0xacb   : > { %2144 = dma.vmem_to_hbm [thread:$0]  (%p2945_p4), %s1656_s15, 16, %s1653_s6, %s1628_s24  }
 0xacc PF: > { %s3353_s26 = sld [smem:[#allocation24_spill]]  ;;  %p2183_p9 = scmp.ge.s32.totalorder %s2701_s13, 2 }
 0xacd   : > { %s3354_s17 = sld [smem:[#allocation30_spill]] }
 0xad2   : > { %s1667_s22 = sand.u32 1, %s3353_s26  }
 0xad3   : > { %p3355_p8 = scmp.ne.s32.totalorder %s3354_s17, 0  ;;  %s1668_s18 = scalar_lea.sflag [#allocation5], %s1667_s22 }
 0xad5   : > { %p2168_p2 = pnand %p2183_p9, %p3355_p8 }
 0xad7   : > { %p2169_p10 = pneg %p2168_p2 }
 0xad9   : > { %2652 = dma.done.wait (%p2169_p10), %s1668_s18, 128  }
 0xada   : > { %2654 = vsyncadd (%p2169_p10), %s1668_s18, 4294967168  ;;  %s3356_s20 = sld [smem:[#allocation26_spill]] }
 0xadb   : > { %s3357_s12 = sld [smem:[#allocation31_spill]] }
 0xae0   : > { %s1676_s7 = sand.u32 1, %s3356_s20  }
 0xae1   : > { %p3358_p5 = scmp.ne.s32.totalorder %s3357_s12, 0  ;;  %s1677_s11 = scalar_lea.sflag [#allocation16], %s1676_s7 }
 0xae3   : > { %p2171_p1 = pnand %p2183_p9, %p3358_p5 }
 0xae5   : > { %p2172_p3 = pneg %p2171_p1 }
 0xae7   : > { %2656 = dma.done.wait (%p2172_p3), %s1677_s11, 16  }
 0xae8   : > { %2658 = vsyncadd (%p2172_p3), %s1677_s11, 4294967280  ;;  %s37_s13 = sadd.s32 1, %s2701_s13   ;;  %s3359_s21 = sld [smem:[#allocation25_spill]] }
 0xae9   : > { %p34_p4 = scmp.ge.s32.totalorder %s37_s13, 6   ;;  %s3360_s15 = sld [smem:[#allocation27_spill]] }
 0xaea   : > { %s3361_s26 = sld [smem:[#allocation35_spill]]  ;;  %s3365_s22 = smov %s2669_s23 }
 0xaeb   : > { %s3362_s27 = sld [smem:[#allocation28_spill]]  ;;  %s3366_s23 = smov %s2969_s9 }
 0xaec   : > { %s3363_s29 = sld [smem:[#allocation32_spill]]  ;;  %s3367_s24 = smov %s2677_s25 }
 0xaed   : > { %s3364_s6 = sld [smem:[#allocation34_spill]]  ;;  %s3369_s28 = smov %s2697_s30 }
 0xaef   : > { %s3368_s25 = smov %s3360_s15  ;;  %36 = sbr.rel (!%p34_p4) target bundleno = 27 (0x1b), region = 169 }
 0xaf3   : > { %s3370_s30 = smov %s3364_s6 }
 0xaf4   :  { %1681 = vsyncpa [#allocation4], 1 }
 0xaf5   :  { %1683 = vsyncpa [#allocation4 + $0x1], 1 }
 0xaf6   :  { %1684 = vsyncpa [#allocation7], 1 }
 0xaf7   :  { %1686 = vsyncpa [#allocation7 + $0x1], 1 }
 0xaf8   :  { %1687 = vsyncpa [#allocation10], 1 }
 0xaf9   :  { %1688 = vsyncpa [#allocation13], 1 }
 0xafa   :  { %1689 = vsyncpa [#allocation5], 1 }
 0xafb   :  { %1691 = vsyncpa [#allocation5 + $0x1], 1 }
 0xafc   :  { %1692 = vsyncpa [#allocation16], 1 }
 0xafd   :  { %1694 = vsyncpa [#allocation16 + $0x1], 1 }

</bundles_post_ra>
